<compile_context>
chip_gen: v7x
topology: tpu7x:2x2x1
jax: 0.10.0
libtpu: 0.0.40
codegen_flags: <defaults>
</compile_context>

<pallas_src>
import functools

import jax
import jax.numpy as jnp
from jax import lax
from jax.experimental import pallas as pl
from jax.experimental.pallas import tpu as pltpu

NEG_MARGIN = 0.3
US_LOSS_W, SMC_LOSS_W, IC_LOSS_W = 0.4, 0.4, 0.2
NEG_TO_POS_RATE = 3.0              # us_negative_to_positive_rate
HEAD_SEG = 128                     # each head owns one full 128-lane segment
LAB_W = 2 * HEAD_SEG               # packed per-row label / logits slab width
US_LANE, DEN_LANE = 254, 255       # us label & 1/clamp(mask_sum) stash lanes
MAX_ONEHOT_VOCAB = 2048            # in-kernel one-hot gather only below this
VMEM_LIMIT_BYTES = 48 * 1024 * 1024  # > 32 MiB scoped default, < v7x 64 MiB


def _joint_loss_kernel(ids_ref, mask_ref, labels_ref, table_ref,
                       wenc_ref, benc_ref, wheads_ref, bheads_ref, out_ref,
                       *, n_smc, n_ic, total_b, tok_dtype):
    R = labels_ref.shape[0]          # 2*TILE_B rows: [0,TB)=utt0, [TB,2TB)=utt1
    TB = R // 2
    RS = ids_ref.shape[0]            # R * S flattened token rows
    S = RS // R
    Vp, H = table_ref.shape

    labels = labels_ref[...]                                      # (R, 256)

    # ---- embedding gather, in-kernel, as an exact one-hot MXU matmul ----
    ids = ids_ref[...]                                            # (RS, 1) i32
    vocab = lax.broadcasted_iota(jnp.int32, (RS, Vp), 1)
    onehot = jnp.where(vocab == ids, 1.0, 0.0).astype(jnp.bfloat16)
    x = jnp.dot(onehot, table_ref[...],
                preferred_element_type=jnp.float32).astype(jnp.bfloat16)

    # ---- synthetic base model: ONE fused encoder matmul over both utts ----
    tok = jnp.tanh((jnp.dot(x, wenc_ref[...],
                            preferred_element_type=jnp.float32)
                    + benc_ref[...]).astype(tok_dtype))           # (RS, H)

    # ---- masked mean pooling: mask applied as a flat sublane column ----
    masked = tok.astype(jnp.float32) * mask_ref[...]              # (RS, H) f32
    summed = jnp.sum(masked.reshape(R, S, H), axis=1)             # (R, H)
    mean_all = summed * labels[:, DEN_LANE:DEN_LANE + 1]          # *1/clamp(Σm)
    mean0, mean1 = mean_all[:TB], mean_all[TB:]

    # ---- cosine similarity + contrastive US loss (exact divides) ----
    eps = 1e-8
    dot01 = jnp.sum(mean0 * mean1, axis=1, keepdims=True)
    n0 = jnp.sqrt(jnp.sum(mean0 * mean0, axis=1, keepdims=True))
    n1 = jnp.sqrt(jnp.sum(mean1 * mean1, axis=1, keepdims=True))
    cos = dot01 / (jnp.maximum(n0, eps) * jnp.maximum(n1, eps))
    us = labels[:TB, US_LANE:US_LANE + 1]
    us_terms = (us * jnp.square(cos - 1.0)
                + (1.0 - us) * jnp.square(jnp.maximum(cos - NEG_MARGIN, 0.0)))
    us_sum = jnp.sum(us_terms)

    # ---- both ClassificationHeads: one bf16 matmul into a (R, 256) slab ----
    logits = (jnp.dot(mean_all.astype(jnp.bfloat16), wheads_ref[...],
                      preferred_element_type=jnp.float32)
              + bheads_ref[...])                                  # (R, 256)

    w_first = 1.0 / (2.0 + NEG_TO_POS_RATE)
    w_second = (1.0 + NEG_TO_POS_RATE) / (2.0 + NEG_TO_POS_RATE)
    row = lax.broadcasted_iota(jnp.int32, (R, 1), 0)
    w_rows = jnp.where(row < TB, w_first, w_second)               # (R, 1)
    lane = lax.broadcasted_iota(jnp.int32, (R, HEAD_SEG), 1)

    # BCEWithLogits on the SMC segment (lanes [0,128), first n_smc valid).
    smc_z, smc_y = logits[:, :HEAD_SEG], labels[:, :HEAD_SEG]
    bce = (jnp.maximum(smc_z, 0.0) - smc_z * smc_y
           + jnp.log(1.0 + jnp.exp(-jnp.abs(smc_z))))
    smc_sum = jnp.sum(jnp.where(lane < n_smc, bce, 0.0) * w_rows)

    # CrossEntropy (one-hot targets) on the IC segment (lanes [128,256)).
    ic_z, ic_y = logits[:, HEAD_SEG:], labels[:, HEAD_SEG:]
    ic_zm = jnp.where(lane < n_ic, ic_z, -1e30)
    zmax = jnp.max(ic_zm, axis=1, keepdims=True)
    lse = zmax + jnp.log(jnp.sum(jnp.exp(ic_zm - zmax), axis=1, keepdims=True))
    tgt = jnp.sum(jnp.where(lane < n_ic, ic_z * ic_y, 0.0),
                  axis=1, keepdims=True)
    ic_sum = jnp.sum((lse - tgt) * w_rows)

    # Weighted contribution of this tile; global-mean denominators are static,
    # so summing tile partials in the wrapper reproduces exact batch means.
    tile_partial = (US_LOSS_W * us_sum / total_b
                    + SMC_LOSS_W * smc_sum / (total_b * n_smc)
                    + IC_LOSS_W * ic_sum / total_b)
    out_ref[...] = jnp.full((8, 128), tile_partial, dtype=jnp.float32)


def _tok_dtype():
    # bf16 tanh only where the EUP has a bf16 path (v6e / v7x); keep f32 on
    # v5e / older generations (no bf16 VPU/EUP -> casts would just add cost).
    try:
        kind = jax.devices()[0].device_kind.lower()
    except Exception:
        kind = ""
    if any(t in kind for t in ("v6", "v7", "tpu6", "tpu7")):
        return jnp.bfloat16
    return jnp.float32


def _pick_tile_b(B, S, H, Vp, tok_bytes, budget=24 << 20, min_tiles=4):
    # Rough per-batch-row VMEM: flat id/mask columns (lane-padded, double-
    # buffered), one-hot + gathered-x + tok + masked intermediates, labels.
    per_row = 2 * S * (1024 + 6 * Vp + H * (6 + tok_bytes)) + 4 * LAB_W
    tb = min(B, max(8, budget // per_row))
    tb -= tb % 8
    tb = max(tb, 8)
    # keep several grid steps for pipelining / megacore when the batch allows
    while tb > 8 and (B % tb != 0 or B // tb < min_tiles):
        tb -= 8
    if B % tb != 0:
        tb = 8
    return tb


def init_params(key, vocab, hidden, smc_num_labels, ic_num_labels):
    k = jax.random.split(key, 4)
    return {
        # bf16 for the big tensors; biases / head weights stay f32 (tiny).
        "emb":   (jax.random.normal(k[0], (vocab, hidden), jnp.float32)
                  * 0.02).astype(jnp.bfloat16),
        "w_enc": (jax.random.normal(k[1], (hidden, hidden), jnp.float32)
                  * 0.02).astype(jnp.bfloat16),
        "b_enc": jnp.zeros((1, hidden), jnp.float32),
        # ClassificationHead.out_proj init: normal(0, 0.02), zero bias.
        "w_smc": jax.random.normal(k[2], (hidden, smc_num_labels),
                                   jnp.float32) * 0.02,
        "b_smc": jnp.zeros((1, smc_num_labels), jnp.float32),
        "w_ic":  jax.random.normal(k[3], (hidden, ic_num_labels),
                                   jnp.float32) * 0.02,
        "b_ic":  jnp.zeros((1, ic_num_labels), jnp.float32),
    }


@jax.jit
def joint_forward(params, input_ids, attention_mask, us_labels,
                  smc_labels, smc_labels_2, ic_labels, ic_labels_2):
    B, _, S = input_ids.shape
    V, H = params["emb"].shape
    n_smc = params["w_smc"].shape[1]
    n_ic = params["w_ic"].shape[1]
    assert B % 8 == 0, "batch must be a multiple of 8"
    assert n_smc <= HEAD_SEG and n_ic <= US_LANE - HEAD_SEG
    # TODO(synk): for vocabularies too large to stage in VMEM, fall back to an
    # in-kernel DMA gather (scalar-prefetched ids + emb table in pl.ANY).
    assert V <= MAX_ONEHOT_VOCAB, "in-kernel one-hot gather needs a small vocab"

    # Pad the sequence to a sublane multiple so the in-kernel (R,S,H) reshape
    # is a free view; padded positions carry mask=0 so pooling is unchanged.
    if S % 8:
        pad = 8 - S % 8
        input_ids = jnp.pad(input_ids, ((0, 0), (0, 0), (0, pad)))
        attention_mask = jnp.pad(attention_mask, ((0, 0), (0, 0), (0, pad)))
        S += pad

    tok_dtype = _tok_dtype()
    Vp = -(-V // 128) * 128
    TILE_B = _pick_tile_b(B, S, H, Vp, jnp.dtype(tok_dtype).itemsize)
    num_tiles = B // TILE_B
    R = 2 * TILE_B

    def pack_rows(x):   # (B, 2, ...) -> (num_tiles * 2 * TILE_B, ...)
        t = x.reshape((num_tiles, TILE_B, 2) + x.shape[2:])
        return jnp.swapaxes(t, 1, 2).reshape((2 * B,) + x.shape[2:])

    # Per-token inputs as flat sublane columns (tile-interleaved, utt0|utt1).
    ids_col = pack_rows(input_ids.astype(jnp.int32)).reshape(2 * B * S, 1)
    mask_col = pack_rows(attention_mask.astype(jnp.float32)).reshape(2 * B * S, 1)

    # All tiny label inputs packed into ONE lane-dense (rows, 256) slab:
    #   lanes [0,128)  : SMC multi-label targets (zero padded)
    #   lanes [128,256): IC one-hot targets (zero padded)
    #   lane 254 / 255 : us label / 1 / clamp(mask_sum, 1e-9)
    inv_den = 1.0 / jnp.maximum(
        attention_mask.astype(jnp.float32).sum(-1), 1e-9)          # (B, 2)
    lab = jnp.zeros((B, 2, LAB_W), jnp.float32)
    lab = lab.at[:, 0, :n_smc].set(smc_labels.astype(jnp.float32))
    lab = lab.at[:, 1, :n_smc].set(smc_labels_2.astype(jnp.float32))
    lab = lab.at[:, 0, HEAD_SEG:HEAD_SEG + n_ic].set(
        jax.nn.one_hot(ic_labels, n_ic, dtype=jnp.float32))
    lab = lab.at[:, 1, HEAD_SEG:HEAD_SEG + n_ic].set(
        jax.nn.one_hot(ic_labels_2, n_ic, dtype=jnp.float32))
    lab = lab.at[:, :, US_LANE].set(us_labels.astype(jnp.float32)[:, None])
    lab = lab.at[:, :, DEN_LANE].set(inv_den)
    labels = pack_rows(lab)                                        # (2B, 256)

    # Weights: vocab-padded bf16 table, bf16 encoder, packed bf16 head slab
    # (each head in its own full 128-lane segment).
    table = jnp.pad(params["emb"], ((0, Vp - V), (0, 0)))          # (Vp, H)
    w_heads = jnp.zeros((H, LAB_W), jnp.float32)
    w_heads = w_heads.at[:, :n_smc].set(params["w_smc"])
    w_heads = w_heads.at[:, HEAD_SEG:HEAD_SEG + n_ic].set(params["w_ic"])
    w_heads = w_heads.astype(jnp.bfloat16)
    b_heads = jnp.zeros((1, LAB_W), jnp.float32)
    b_heads = b_heads.at[:, :n_smc].set(params["b_smc"])
    b_heads = b_heads.at[:, HEAD_SEG:HEAD_SEG + n_ic].set(params["b_ic"])

    kernel = functools.partial(_joint_loss_kernel, n_smc=n_smc, n_ic=n_ic,
                               total_b=B, tok_dtype=tok_dtype)
    rep = lambda i: (0, 0)          # weights: same block every grid step
    tile = lambda i: (i, 0)         # per-batch-tile blocks

    out = pl.pallas_call(
        kernel,
        grid=(num_tiles,),
        in_specs=[
            pl.BlockSpec((R * S, 1), tile),        # token ids (flat column)
            pl.BlockSpec((R * S, 1), tile),        # attention mask (flat col)
            pl.BlockSpec((R, LAB_W), tile),        # packed label slab
            pl.BlockSpec((Vp, H), rep),            # embedding table (bf16)
            pl.BlockSpec((H, H), rep),             # encoder weight (bf16)
            pl.BlockSpec((1, H), rep),             # encoder bias
            pl.BlockSpec((H, LAB_W), rep),         # packed head weights (bf16)
            pl.BlockSpec((1, LAB_W), rep),         # packed head bias
        ],
        out_specs=pl.BlockSpec((8, 128), tile),
        out_shape=jax.ShapeDtypeStruct((num_tiles * 8, 128), jnp.float32),
        compiler_params=pltpu.CompilerParams(
            dimension_semantics=("parallel",),      # megacore split on v7x
            vmem_limit_bytes=VMEM_LIMIT_BYTES),
    )(ids_col, mask_col, labels, table,
      params["w_enc"], params["b_enc"], w_heads, b_heads)

    # Each tile broadcast its weighted partial over one (8,128) block; summing
    # one element per tile gives the exact total loss.
    return jnp.sum(out.reshape(num_tiles, 8, 128)[:, 0, 0])


if __name__ == "__main__":
    B, S, H, V = 16, 16, 128, 100
    SMC_NUM_LABELS, IC_NUM_LABELS = 8, 8

    key = jax.random.PRNGKey(0)
    kp, ki, km, ku, ks1, ks2, kc1, kc2 = jax.random.split(key, 8)

    params = init_params(kp, V, H, SMC_NUM_LABELS, IC_NUM_LABELS)

    input_ids = jax.random.randint(ki, (B, 2, S), 0, V)
    lens = jax.random.randint(km, (B, 2), 4, S + 1)
    attention_mask = (jnp.arange(S)[None, None, :]
                      < lens[:, :, None]).astype(jnp.int32)
    us_labels = jax.random.bernoulli(ku, 0.25, (B,)).astype(jnp.float32)
    smc_labels = jax.random.bernoulli(
        ks1, 0.3, (B, SMC_NUM_LABELS)).astype(jnp.float32)
    smc_labels_2 = jax.random.bernoulli(
        ks2, 0.3, (B, SMC_NUM_LABELS)).astype(jnp.float32)
    ic_labels = jax.random.randint(kc1, (B,), 0, IC_NUM_LABELS)
    ic_labels_2 = jax.random.randint(kc2, (B,), 0, IC_NUM_LABELS)

    total_loss = joint_forward(params, input_ids, attention_mask, us_labels,
                               smc_labels, smc_labels_2, ic_labels,
                               ic_labels_2)
    jax.block_until_ready(total_loss)
    assert jnp.isfinite(total_loss)
    print("KERNEL_OK")
</pallas_src>

<mosaic_0001>
module attributes {stable_mosaic.version = 11 : i64} {
  func.func @_joint_loss_kernel(%arg0: i32, %arg1: memref<256x1xi32, #tpu.memory_space<vmem>>, %arg2: memref<256x1xf32, #tpu.memory_space<vmem>>, %arg3: memref<16x256xf32, #tpu.memory_space<vmem>>, %arg4: memref<128x128xbf16, #tpu.memory_space<vmem>>, %arg5: memref<128x128xbf16, #tpu.memory_space<vmem>>, %arg6: memref<1x128xf32, #tpu.memory_space<vmem>>, %arg7: memref<128x256xbf16, #tpu.memory_space<vmem>>, %arg8: memref<1x256xf32, #tpu.memory_space<vmem>>, %arg9: memref<8x128xf32, #tpu.memory_space<vmem>>) attributes {dimension_semantics = [#tpu.dimension_semantics<parallel>], iteration_bounds = array<i64: 2>, scalar_prefetch = 0 : i64, scratch_operands = 0 : i64, tpu.core_type = #tpu.core_type<tc>, window_params = [{transform_indices = @transform_0, window_bounds = array<i64: 256, 1>}, {transform_indices = @transform_1, window_bounds = array<i64: 256, 1>}, {transform_indices = @transform_2, window_bounds = array<i64: 16, 256>}, {pipeline_mode = #tpu.pipeline_mode<synchronous>, transform_indices = @transform_3, window_bounds = array<i64: 128, 128>}, {pipeline_mode = #tpu.pipeline_mode<synchronous>, transform_indices = @transform_4, window_bounds = array<i64: 128, 128>}, {pipeline_mode = #tpu.pipeline_mode<synchronous>, transform_indices = @transform_5, window_bounds = array<i64: 1, 128>}, {pipeline_mode = #tpu.pipeline_mode<synchronous>, transform_indices = @transform_6, window_bounds = array<i64: 128, 256>}, {pipeline_mode = #tpu.pipeline_mode<synchronous>, transform_indices = @transform_7, window_bounds = array<i64: 1, 256>}, {transform_indices = @transform_8, window_bounds = array<i64: 8, 128>}]} {
    %c0 = arith.constant 0 : index
    %c0_0 = arith.constant 0 : index
    %0 = vector.load %arg3[%c0, %c0_0] : memref<16x256xf32, #tpu.memory_space<vmem>>, vector<16x256xf32>
    %c0_1 = arith.constant 0 : index
    %c0_2 = arith.constant 0 : index
    %1 = vector.load %arg1[%c0_1, %c0_2] : memref<256x1xi32, #tpu.memory_space<vmem>>, vector<256x1xi32>
    %2 = tpu.iota {dimensions = array<i32: 1>} : vector<256x128xi32>
    %3 = vector.broadcast %1 : vector<256x1xi32> to vector<256x128xi32>
    %4 = arith.cmpi eq, %2, %3 : vector<256x128xi32>
    %cst = arith.constant 1.000000e+00 : f32
    %cst_3 = arith.constant 0.000000e+00 : f32
    %5 = vector.broadcast %cst : f32 to vector<256x128xf32>
    %6 = vector.broadcast %cst_3 : f32 to vector<256x128xf32>
    %7 = arith.select %4, %5, %6 : vector<256x128xi1>, vector<256x128xf32>
    %8 = arith.truncf %7 : vector<256x128xf32> to vector<256x128xbf16>
    %c0_4 = arith.constant 0 : index
    %c0_5 = arith.constant 0 : index
    %9 = vector.load %arg4[%c0_4, %c0_5] : memref<128x128xbf16, #tpu.memory_space<vmem>>, vector<128x128xbf16>
    %cst_6 = arith.constant dense<0.000000e+00> : vector<256x128xf32>
    %10 = tpu.matmul %8, %9, %cst_6 {dimension_numbers = #tpu.dot_dimension_numbers<[1], [0], [0], [1], [0, 0, 1, 1], [], []>} : vector<256x128xbf16>, vector<128x128xbf16>, vector<256x128xf32> -> vector<256x128xf32>
    %11 = arith.truncf %10 : vector<256x128xf32> to vector<256x128xbf16>
    %c0_7 = arith.constant 0 : index
    %c0_8 = arith.constant 0 : index
    %12 = vector.load %arg5[%c0_7, %c0_8] : memref<128x128xbf16, #tpu.memory_space<vmem>>, vector<128x128xbf16>
    %cst_9 = arith.constant dense<0.000000e+00> : vector<256x128xf32>
    %13 = tpu.matmul %11, %12, %cst_9 {dimension_numbers = #tpu.dot_dimension_numbers<[1], [0], [0], [1], [0, 0, 1, 1], [], []>} : vector<256x128xbf16>, vector<128x128xbf16>, vector<256x128xf32> -> vector<256x128xf32>
    %c0_10 = arith.constant 0 : index
    %c0_11 = arith.constant 0 : index
    %14 = vector.load %arg6[%c0_10, %c0_11] : memref<1x128xf32, #tpu.memory_space<vmem>>, vector<1x128xf32>
    %15 = vector.broadcast %14 : vector<1x128xf32> to vector<256x128xf32>
    %16 = arith.addf %13, %15 : vector<256x128xf32>
    %17 = math.tanh %16 : vector<256x128xf32>
    %c0_12 = arith.constant 0 : index
    %c0_13 = arith.constant 0 : index
    %18 = vector.load %arg2[%c0_12, %c0_13] : memref<256x1xf32, #tpu.memory_space<vmem>>, vector<256x1xf32>
    %19 = vector.broadcast %18 : vector<256x1xf32> to vector<256x128xf32>
    %20 = arith.mulf %17, %19 : vector<256x128xf32>
    %21 = vector.shape_cast %20 : vector<256x128xf32> to vector<16x16x128xf32>
    %cst_14 = arith.constant dense<0.000000e+00> : vector<16x128xf32>
    %22 = vector.multi_reduction <add>, %21, %cst_14 [1] : vector<16x16x128xf32> to vector<16x128xf32>
    %23 = vector.extract_strided_slice %0 {offsets = [0, 255], sizes = [16, 1], strides = [1, 1]} : vector<16x256xf32> to vector<16x1xf32>
    %24 = vector.broadcast %23 : vector<16x1xf32> to vector<16x128xf32>
    %25 = arith.mulf %22, %24 : vector<16x128xf32>
    %26 = vector.extract_strided_slice %25 {offsets = [0, 0], sizes = [8, 128], strides = [1, 1]} : vector<16x128xf32> to vector<8x128xf32>
    %27 = vector.extract_strided_slice %25 {offsets = [8, 0], sizes = [8, 128], strides = [1, 1]} : vector<16x128xf32> to vector<8x128xf32>
    %28 = arith.mulf %26, %27 : vector<8x128xf32>
    %cst_15 = arith.constant dense<0.000000e+00> : vector<8xf32>
    %29 = vector.multi_reduction <add>, %28, %cst_15 [1] : vector<8x128xf32> to vector<8xf32>
    %30 = vector.shape_cast %29 : vector<8xf32> to vector<8x1xf32>
    %31 = arith.mulf %26, %26 : vector<8x128xf32>
    %cst_16 = arith.constant dense<0.000000e+00> : vector<8xf32>
    %32 = vector.multi_reduction <add>, %31, %cst_16 [1] : vector<8x128xf32> to vector<8xf32>
    %33 = vector.shape_cast %32 : vector<8xf32> to vector<8x1xf32>
    %34 = math.sqrt %33 : vector<8x1xf32>
    %35 = arith.mulf %27, %27 : vector<8x128xf32>
    %cst_17 = arith.constant dense<0.000000e+00> : vector<8xf32>
    %36 = vector.multi_reduction <add>, %35, %cst_17 [1] : vector<8x128xf32> to vector<8xf32>
    %37 = vector.shape_cast %36 : vector<8xf32> to vector<8x1xf32>
    %38 = math.sqrt %37 : vector<8x1xf32>
    %cst_18 = arith.constant 9.99999993E-9 : f32
    %39 = vector.broadcast %cst_18 : f32 to vector<8x1xf32>
    %40 = arith.maximumf %34, %39 : vector<8x1xf32>
    %cst_19 = arith.constant 9.99999993E-9 : f32
    %41 = vector.broadcast %cst_19 : f32 to vector<8x1xf32>
    %42 = arith.maximumf %38, %41 : vector<8x1xf32>
    %43 = arith.mulf %40, %42 : vector<8x1xf32>
    %44 = arith.divf %30, %43 : vector<8x1xf32>
    %45 = vector.extract_strided_slice %0 {offsets = [0, 254], sizes = [8, 1], strides = [1, 1]} : vector<16x256xf32> to vector<8x1xf32>
    %cst_20 = arith.constant 1.000000e+00 : f32
    %46 = vector.broadcast %cst_20 : f32 to vector<8x1xf32>
    %47 = arith.subf %44, %46 : vector<8x1xf32>
    %48 = arith.mulf %47, %47 : vector<8x1xf32>
    %49 = arith.mulf %45, %48 : vector<8x1xf32>
    %cst_21 = arith.constant 1.000000e+00 : f32
    %50 = vector.broadcast %cst_21 : f32 to vector<8x1xf32>
    %51 = arith.subf %50, %45 : vector<8x1xf32>
    %cst_22 = arith.constant 3.000000e-01 : f32
    %52 = vector.broadcast %cst_22 : f32 to vector<8x1xf32>
    %53 = arith.subf %44, %52 : vector<8x1xf32>
    %cst_23 = arith.constant 0.000000e+00 : f32
    %54 = vector.broadcast %cst_23 : f32 to vector<8x1xf32>
    %55 = arith.maximumf %53, %54 : vector<8x1xf32>
    %56 = arith.mulf %55, %55 : vector<8x1xf32>
    %57 = arith.mulf %51, %56 : vector<8x1xf32>
    %58 = arith.addf %49, %57 : vector<8x1xf32>
    %59 = vector.shape_cast %58 : vector<8x1xf32> to vector<1x8x1xf32>
    %cst_24 = arith.constant dense<0.000000e+00> : vector<1xf32>
    %60 = vector.multi_reduction <add>, %59, %cst_24 [1, 2] : vector<1x8x1xf32> to vector<1xf32>
    %61 = vector.shape_cast %60 : vector<1xf32> to vector<1x1x1xf32>
    %62 = vector.extract %61[0, 0, 0] : f32 from vector<1x1x1xf32>
    %63 = arith.truncf %25 : vector<16x128xf32> to vector<16x128xbf16>
    %c0_25 = arith.constant 0 : index
    %c0_26 = arith.constant 0 : index
    %64 = vector.load %arg7[%c0_25, %c0_26] : memref<128x256xbf16, #tpu.memory_space<vmem>>, vector<128x256xbf16>
    %cst_27 = arith.constant dense<0.000000e+00> : vector<16x256xf32>
    %65 = tpu.matmul %63, %64, %cst_27 {dimension_numbers = #tpu.dot_dimension_numbers<[1], [0], [0], [1], [0, 0, 1, 1], [], []>} : vector<16x128xbf16>, vector<128x256xbf16>, vector<16x256xf32> -> vector<16x256xf32>
    %c0_28 = arith.constant 0 : index
    %c0_29 = arith.constant 0 : index
    %66 = vector.load %arg8[%c0_28, %c0_29] : memref<1x256xf32, #tpu.memory_space<vmem>>, vector<1x256xf32>
    %67 = vector.broadcast %66 : vector<1x256xf32> to vector<16x256xf32>
    %68 = arith.addf %65, %67 : vector<16x256xf32>
    %69 = tpu.iota {dimensions = array<i32: 0>} : vector<16x1xi32>
    %c8_i32 = arith.constant 8 : i32
    %70 = vector.broadcast %c8_i32 : i32 to vector<16x1xi32>
    %71 = arith.cmpi slt, %69, %70 : vector<16x1xi32>
    %cst_30 = arith.constant 2.000000e-01 : f32
    %cst_31 = arith.constant 8.000000e-01 : f32
    %72 = vector.broadcast %cst_30 : f32 to vector<16x1xf32>
    %73 = vector.broadcast %cst_31 : f32 to vector<16x1xf32>
    %74 = arith.select %71, %72, %73 : vector<16x1xi1>, vector<16x1xf32>
    %75 = tpu.iota {dimensions = array<i32: 1>} : vector<16x128xi32>
    %76 = vector.extract_strided_slice %68 {offsets = [0, 0], sizes = [16, 128], strides = [1, 1]} : vector<16x256xf32> to vector<16x128xf32>
    %77 = vector.extract_strided_slice %0 {offsets = [0, 0], sizes = [16, 128], strides = [1, 1]} : vector<16x256xf32> to vector<16x128xf32>
    %cst_32 = arith.constant 0.000000e+00 : f32
    %78 = vector.broadcast %cst_32 : f32 to vector<16x128xf32>
    %79 = arith.maximumf %76, %78 : vector<16x128xf32>
    %80 = arith.mulf %76, %77 : vector<16x128xf32>
    %81 = arith.subf %79, %80 : vector<16x128xf32>
    %82 = math.absf %76 : vector<16x128xf32>
    %cst_33 = arith.constant 0.000000e+00 : f32
    %83 = vector.broadcast %cst_33 : f32 to vector<16x128xf32>
    %84 = arith.subf %83, %82 : vector<16x128xf32>
    %85 = math.exp %84 : vector<16x128xf32>
    %cst_34 = arith.constant 1.000000e+00 : f32
    %86 = vector.broadcast %cst_34 : f32 to vector<16x128xf32>
    %87 = arith.addf %86, %85 : vector<16x128xf32>
    %88 = math.log %87 : vector<16x128xf32>
    %89 = arith.addf %81, %88 : vector<16x128xf32>
    %c8_i32_35 = arith.constant 8 : i32
    %90 = vector.broadcast %c8_i32_35 : i32 to vector<16x128xi32>
    %91 = arith.cmpi slt, %75, %90 : vector<16x128xi32>
    %cst_36 = arith.constant 0.000000e+00 : f32
    %92 = vector.broadcast %cst_36 : f32 to vector<16x128xf32>
    %93 = arith.select %91, %89, %92 : vector<16x128xi1>, vector<16x128xf32>
    %94 = vector.broadcast %74 : vector<16x1xf32> to vector<16x128xf32>
    %95 = arith.mulf %93, %94 : vector<16x128xf32>
    %96 = vector.shape_cast %95 : vector<16x128xf32> to vector<1x16x128xf32>
    %cst_37 = arith.constant dense<0.000000e+00> : vector<1xf32>
    %97 = vector.multi_reduction <add>, %96, %cst_37 [1, 2] : vector<1x16x128xf32> to vector<1xf32>
    %98 = vector.shape_cast %97 : vector<1xf32> to vector<1x1x1xf32>
    %99 = vector.extract %98[0, 0, 0] : f32 from vector<1x1x1xf32>
    %100 = vector.extract_strided_slice %68 {offsets = [0, 128], sizes = [16, 128], strides = [1, 1]} : vector<16x256xf32> to vector<16x128xf32>
    %101 = vector.extract_strided_slice %0 {offsets = [0, 128], sizes = [16, 128], strides = [1, 1]} : vector<16x256xf32> to vector<16x128xf32>
    %c8_i32_38 = arith.constant 8 : i32
    %102 = vector.broadcast %c8_i32_38 : i32 to vector<16x128xi32>
    %103 = arith.cmpi slt, %75, %102 : vector<16x128xi32>
    %cst_39 = arith.constant -1.000000e+30 : f32
    %104 = vector.broadcast %cst_39 : f32 to vector<16x128xf32>
    %105 = arith.select %103, %100, %104 : vector<16x128xi1>, vector<16x128xf32>
    %cst_40 = arith.constant dense<0xFF800000> : vector<16xf32>
    %106 = vector.multi_reduction <maximumf>, %105, %cst_40 [1] : vector<16x128xf32> to vector<16xf32>
    %107 = vector.shape_cast %106 : vector<16xf32> to vector<16x1xf32>
    %108 = vector.broadcast %107 : vector<16x1xf32> to vector<16x128xf32>
    %109 = arith.subf %105, %108 : vector<16x128xf32>
    %110 = math.exp %109 : vector<16x128xf32>
    %cst_41 = arith.constant dense<0.000000e+00> : vector<16xf32>
    %111 = vector.multi_reduction <add>, %110, %cst_41 [1] : vector<16x128xf32> to vector<16xf32>
    %112 = vector.shape_cast %111 : vector<16xf32> to vector<16x1xf32>
    %113 = math.log %112 : vector<16x1xf32>
    %114 = arith.addf %107, %113 : vector<16x1xf32>
    %c8_i32_42 = arith.constant 8 : i32
    %115 = vector.broadcast %c8_i32_42 : i32 to vector<16x128xi32>
    %116 = arith.cmpi slt, %75, %115 : vector<16x128xi32>
    %117 = arith.mulf %100, %101 : vector<16x128xf32>
    %cst_43 = arith.constant 0.000000e+00 : f32
    %118 = vector.broadcast %cst_43 : f32 to vector<16x128xf32>
    %119 = arith.select %116, %117, %118 : vector<16x128xi1>, vector<16x128xf32>
    %cst_44 = arith.constant dense<0.000000e+00> : vector<16xf32>
    %120 = vector.multi_reduction <add>, %119, %cst_44 [1] : vector<16x128xf32> to vector<16xf32>
    %121 = vector.shape_cast %120 : vector<16xf32> to vector<16x1xf32>
    %122 = arith.subf %114, %121 : vector<16x1xf32>
    %123 = arith.mulf %122, %74 : vector<16x1xf32>
    %124 = vector.shape_cast %123 : vector<16x1xf32> to vector<1x16x1xf32>
    %cst_45 = arith.constant dense<0.000000e+00> : vector<1xf32>
    %125 = vector.multi_reduction <add>, %124, %cst_45 [1, 2] : vector<1x16x1xf32> to vector<1xf32>
    %126 = vector.shape_cast %125 : vector<1xf32> to vector<1x1x1xf32>
    %127 = vector.extract %126[0, 0, 0] : f32 from vector<1x1x1xf32>
    %cst_46 = arith.constant 4.000000e-01 : f32
    %128 = arith.mulf %cst_46, %62 : f32
    %cst_47 = arith.constant 1.600000e+01 : f32
    %129 = arith.divf %128, %cst_47 : f32
    %cst_48 = arith.constant 4.000000e-01 : f32
    %130 = arith.mulf %cst_48, %99 : f32
    %cst_49 = arith.constant 1.280000e+02 : f32
    %131 = arith.divf %130, %cst_49 : f32
    %132 = arith.addf %129, %131 : f32
    %cst_50 = arith.constant 2.000000e-01 : f32
    %133 = arith.mulf %cst_50, %127 : f32
    %cst_51 = arith.constant 1.600000e+01 : f32
    %134 = arith.divf %133, %cst_51 : f32
    %135 = arith.addf %132, %134 : f32
    %136 = vector.broadcast %135 : f32 to vector<8x128xf32>
    %c0_52 = arith.constant 0 : index
    %c0_53 = arith.constant 0 : index
    %137 = vector.load %arg9[%c0_52, %c0_53] : memref<8x128xf32, #tpu.memory_space<vmem>>, vector<8x128xf32>
    tpu.vector_store %arg9[%c0_52, %c0_53], %136 {strides = array<i32>} : memref<8x128xf32, #tpu.memory_space<vmem>>, vector<8x128xf32>,
    return
  }
  func.func @transform_0(%arg0: i32) -> (i32, i32) {
    %c0_i32 = arith.constant 0 : i32
    %c0_i32_0 = arith.constant 0 : i32
    return %arg0, %c0_i32 : i32, i32
  }
  func.func @transform_1(%arg0: i32) -> (i32, i32) {
    %c0_i32 = arith.constant 0 : i32
    %c0_i32_0 = arith.constant 0 : i32
    return %arg0, %c0_i32 : i32, i32
  }
  func.func @transform_2(%arg0: i32) -> (i32, i32) {
    %c0_i32 = arith.constant 0 : i32
    %c0_i32_0 = arith.constant 0 : i32
    return %arg0, %c0_i32 : i32, i32
  }
  func.func @transform_3(%arg0: i32) -> (i32, i32) {
    %c0_i32 = arith.constant 0 : i32
    %c0_i32_0 = arith.constant 0 : i32
    %c0_i32_1 = arith.constant 0 : i32
    return %c0_i32, %c0_i32_0 : i32, i32
  }
  func.func @transform_4(%arg0: i32) -> (i32, i32) {
    %c0_i32 = arith.constant 0 : i32
    %c0_i32_0 = arith.constant 0 : i32
    %c0_i32_1 = arith.constant 0 : i32
    return %c0_i32, %c0_i32_0 : i32, i32
  }
  func.func @transform_5(%arg0: i32) -> (i32, i32) {
    %c0_i32 = arith.constant 0 : i32
    %c0_i32_0 = arith.constant 0 : i32
    %c0_i32_1 = arith.constant 0 : i32
    return %c0_i32, %c0_i32_0 : i32, i32
  }
  func.func @transform_6(%arg0: i32) -> (i32, i32) {
    %c0_i32 = arith.constant 0 : i32
    %c0_i32_0 = arith.constant 0 : i32
    %c0_i32_1 = arith.constant 0 : i32
    return %c0_i32, %c0_i32_0 : i32, i32
  }
  func.func @transform_7(%arg0: i32) -> (i32, i32) {
    %c0_i32 = arith.constant 0 : i32
    %c0_i32_0 = arith.constant 0 : i32
    %c0_i32_1 = arith.constant 0 : i32
    return %c0_i32, %c0_i32_0 : i32, i32
  }
  func.func @transform_8(%arg0: i32) -> (i32, i32) {
    %c0_i32 = arith.constant 0 : i32
    %c0_i32_0 = arith.constant 0 : i32
    return %arg0, %c0_i32 : i32, i32
  }
}

</mosaic_0001>

<bundles_post_ra>
// kernel: joint_forward.1
= control target key start
LH: loop header
LB: loop body
LE: loop exit
PB: predicated region body
PF: predicated region fallthrough
CT: control target
= control target key end

     0   :  { %s2458_s27 = smov 0   ;;  %s3094_s0 = inlined_call_operand.vmem [shape: s32[512,1], index: 0, kind: input, shape index: {}]   ;;  %s3095_s1 = inlined_call_operand.vmem [shape: f32[512,1], index: 1, kind: input, shape index: {}]   ;;  %s3096_s2 = inlined_call_operand.vmem [shape: f32[32,256], index: 2, kind: input, shape index: {}]   ;;  %s3097_s3 = inlined_call_operand.vmem [shape: bf16[128,128], index: 3, kind: input, shape index: {}]   ;;  %s3098_s4 = inlined_call_operand.vmem [shape: bf16[128,128], index: 4, kind: input, shape index: {}]   ;;  %s3099_s5 = inlined_call_operand.vmem [shape: f32[1,128], index: 5, kind: input, shape index: {}]   ;;  %s3100_s6 = inlined_call_operand.vmem [shape: bf16[128,256], index: 6, kind: input, shape index: {}]   ;;  %s3101_s7 = inlined_call_operand.vmem [shape: f32[1,256], index: 7, kind: input, shape index: {}]   ;;  %s3102_s8 = inlined_call_operand.vmem [shape: f32[16,128], index: 8, kind: output, shape index: {}]  }
   0x1 LB: > { %s2464_s28 = sadd.s32 4294967295, %s2407_s27   ;;  %p2028_p0 = scmp.ge.s32.totalorder %s2407_s27, 1  ;;  %s2407_s27 = sphi %s2458_s27, %s18_s27  }
   0x2   : > { %p286_p1 = scmp.lt.s32.totalorder %s2407_s27, 3 }
   0x4   : > { %p287_p2 = pnand %p2028_p0, %p286_p1 }
   0x5   : > { %s2029_s29 = sshll.u32 (!%p287_p2), %s2464_s28, 5  ;;  %v2409_v0 = vmov (!%p287_p2), 0   ;;  %v2273_v1 = vld [vmem:[%s3097_s3] sm:$0xff] (!%p287_p2)   ;;  %v2274_v2 = vld [vmem:[%s3097_s3 + $0x8] sm:$0xff] (!%p287_p2)   ;;  %v2275_v3 = vld [vmem:[%s3097_s3 + $0x10] sm:$0xff] (!%p287_p2)   ;;  %s2033_s30 = sshll.u32 (!%p287_p2), %s2464_s28, 1 }
   0x6   : > { %290 = sbr.rel (%p287_p2) target bundleno = 1436 (0x59c), region = 52  ;;  %2270 = vset.pattern.permute.xlu1 (!%p287_p2), %v2409_v0  ;;  %2269 = vset.pattern.permute.xlu0 (!%p287_p2), %v2409_v0  ;;  %p331_p3 = scmp.lt.s32.totalorder (!%p287_p2), %s2029_s29, 63  ;;  %v2276_v8 = vld [vmem:[%s3097_s3 + $0x18] sm:$0xff] (!%p287_p2)   ;;  %v2277_v11 = vld [vmem:[%s3097_s3 + $0x20] sm:$0xff] (!%p287_p2)   ;;  %v2278_v14 = vld [vmem:[%s3097_s3 + $0x28] sm:$0xff] (!%p287_p2)  }
   0x7   : > { %2155 = vmatprep.subr.bf16.mxu0 (!%p287_p2), %v2273_v1  ;;  %v2279_v21 = vld [vmem:[%s3097_s3 + $0x30] sm:$0xff] (!%p287_p2)   ;;  %v2280_v22 = vld [vmem:[%s3097_s3 + $0x38] sm:$0xff] (!%p287_p2)   ;;  %p343_p4 = scmp.lt.s32.totalorder (!%p287_p2), %s2033_s30, 3  ;;  %p349_p5 = scmp.lt.s32.totalorder (!%p287_p2), %s2464_s28, 1 }
   0x8   : > { %2156 = vmatpush3.bf16.msra.mxu0 (!%p287_p2), %v2273_v1 }
   0x9   : > { %2157 = vmatprep.subr.bf16.mxu0 (!%p287_p2), %v2274_v2 }
   0xc   : > { %2158 = vmatpush3.bf16.msra.mxu0 (!%p287_p2), %v2274_v2 }
   0xd   : > { %s3107_s29 = smov (!%p331_p3, %s2029_s29), 63  ;;  %2159 = vmatprep.subr.bf16.mxu0 %v2275_v3  ;;  %s3109_s30 = smov (!%p343_p4, %s2033_s30), 3 }
   0xe   : > { %s2030_s12 = sshll.u32 %s3107_s29, 3  ;;  %s2106_s9 = sshll.u32 %s3109_s30, 4 }
   0xf   : > { %s2485_s15 = scalar_lea.vmem %s3094_s0, %s2030_s12  ;;  %s2542_s11 = scalar_lea.vmem %s3095_s1, %s2030_s12 }
  0x10   : > { %v360_v4 = vld [vmem:[%s2485_s15 + $0x10] sm:$0xff]  ;;  %v358_v5 = vld [vmem:[%s2485_s15] sm:$0xff]  ;;  %v361_v6 = vld [vmem:[%s2485_s15 + $0x18] sm:$0xff]  ;;  %2160 = vmatpush3.bf16.msra.mxu0 %v2275_v3  ;;  %s2656_s29 = scalar_lea.vmem %s3096_s2, %s2106_s9  ;;  %s3111_s28 = smov (!%p349_p5, %s2464_s28), 1 }
  0x11   : > { %399 = vperm.xlu1 %2270, %v360_v4   ;;  %393 = vperm.xlu0 %2269, %v358_v5   ;;  %v359_v7 = vld [vmem:[%s2485_s15 + $0x8] sm:$0xff]  ;;  %v362_v10 = vld [vmem:[%s2485_s15 + $0x20] sm:$0xff]  ;;  %v365_v12 = vld [vmem:[%s2485_s15 + $0x38] sm:$0xff]  ;;  %s2036_s18 = sshll.u32 %s3111_s28, 3 }
  0x12   : > { %v363_v9 = vld [vmem:[%s2485_s15 + $0x28] sm:$0xff]  ;;  %2161 = vmatprep.subr.bf16.mxu0 %v2276_v8  ;;  %v364_v13 = vld [vmem:[%s2485_s15 + $0x30] sm:$0xff]  ;;  %v366_v16 = vld [vmem:[%s2485_s15 + $0x40] sm:$0xff]  ;;  %s352_s23 = scalar_lea.vmem %s3102_s8, %s2036_s18 }
  0x13   : > { %v367_v15 = vld [vmem:[%s2485_s15 + $0x48] sm:$0xff]  ;;  %v369_v17 = vld [vmem:[%s2485_s15 + $0x58] sm:$0xff]  ;;  %v368_v18 = vld [vmem:[%s2485_s15 + $0x50] sm:$0xff] }
  0x14   : > { %2162 = vmatpush3.bf16.msra.mxu0 %v2276_v8  ;;  %v371_v19 = vld [vmem:[%s2485_s15 + $0x68] sm:$0xff]  ;;  %v370_v20 = vld [vmem:[%s2485_s15 + $0x60] sm:$0xff]  ;;  %v373_v23 = vld [vmem:[%s2485_s15 + $0x78] sm:$0xff] }
  0x15   : > { %402 = vperm.xlu1 %2270, %v361_v6   ;;  %396 = vperm.xlu0 %2269, %v359_v7   ;;  %v372_v24 = vld [vmem:[%s2485_s15 + $0x70] sm:$0xff]  ;;  %v375_v25 = vld [vmem:[%s2485_s15 + $0x88] sm:$0xff]  ;;  %v374_v26 = vld [vmem:[%s2485_s15 + $0x80] sm:$0xff] }
  0x16   : > { %2163 = vmatprep.subr.bf16.mxu0 %v2277_v11  ;;  %v377_v27 = vld [vmem:[%s2485_s15 + $0x98] sm:$0xff]  ;;  %v376_v28 = vld [vmem:[%s2485_s15 + $0x90] sm:$0xff]  ;;  %v379_v29 = vld [vmem:[%s2485_s15 + $0xa8] sm:$0xff] }
  0x17   : > { %v378_v30 = vld [vmem:[%s2485_s15 + $0xa0] sm:$0xff]  ;;  %v381_v31 = vld [vmem:[%s2485_s15 + $0xb8] sm:$0xff]  ;;  %v380_v32 = vld [vmem:[%s2485_s15 + $0xb0] sm:$0xff] }
  0x18   : > { %2164 = vmatpush3.bf16.msra.mxu0 %v2277_v11  ;;  %v383_v33 = vld [vmem:[%s2485_s15 + $0xc8] sm:$0xff]  ;;  %v382_v34 = vld [vmem:[%s2485_s15 + $0xc0] sm:$0xff]  ;;  %v385_v35 = vld [vmem:[%s2485_s15 + $0xd8] sm:$0xff] }
  0x19   : > { %408 = vperm.xlu1 %2270, %v363_v9   ;;  %405 = vperm.xlu0 %2269, %v362_v10   ;;  %v384_v36 = vld [vmem:[%s2485_s15 + $0xd0] sm:$0xff]  ;;  %v387_v37 = vld [vmem:[%s2485_s15 + $0xe8] sm:$0xff]  ;;  %v386_v38 = vld [vmem:[%s2485_s15 + $0xe0] sm:$0xff] }
  0x1a   : > { %2165 = vmatprep.subr.bf16.mxu0 %v2278_v14  ;;  %v389_v39 = vld [vmem:[%s2485_s15 + $0xf8] sm:$0xff]  ;;  %v388_v40 = vld [vmem:[%s2485_s15 + $0xf0] sm:$0xff]  ;;  %v1078_v45 = vld [vmem:[%s2542_s11 + $0x28] sm:$0xff] }
  0x1b   : > { %v1076_v41 = vld [vmem:[%s2542_s11 + $0x18] sm:$0xff]  ;;  %v1075_v42 = vld [vmem:[%s2542_s11 + $0x10] sm:$0xff]  ;;  %v1077_v46 = vld [vmem:[%s2542_s11 + $0x20] sm:$0xff] }
  0x1c   : > { %2166 = vmatpush3.bf16.msra.mxu0 %v2278_v14  ;;  %v1092_v43 = vld [vmem:[%s2542_s11 + $0x98] sm:$0xff]  ;;  %v1091_v44 = vld [vmem:[%s2542_s11 + $0x90] sm:$0xff]  ;;  %v1094_v47 = vld [vmem:[%s2542_s11 + $0xa8] sm:$0xff] }
  0x1d   : > { %414 = vperm.xlu1 %2270, %v365_v12   ;;  %411 = vperm.xlu0 %2269, %v364_v13   ;;  %v1093_v48 = vld [vmem:[%s2542_s11 + $0xa0] sm:$0xff]  ;;  %v1074_v49 = vld [vmem:[%s2542_s11 + $0x8] sm:$0xff]  ;;  %v1080_v51 = vld [vmem:[%s2542_s11 + $0x38] sm:$0xff]  ;;  %v3103_v12 = vlaneseq }
  0x1e   : > { %2167 = vmatprep.subr.bf16.mxu0 %v2279_v21  ;;  %v1073_v50 = vld [vmem:[%s2542_s11] sm:$0xff]  ;;  %v1079_v52 = vld [vmem:[%s2542_s11 + $0x30] sm:$0xff]  ;;  %v1090_v53 = vld [vmem:[%s2542_s11 + $0x88] sm:$0xff] }
  0x1f   : > { %v1089_v54 = vld [vmem:[%s2542_s11 + $0x80] sm:$0xff]  ;;  %v1096_v55 = vld [vmem:[%s2542_s11 + $0xb8] sm:$0xff]  ;;  %v1095_v56 = vld [vmem:[%s2542_s11 + $0xb0] sm:$0xff] }
  0x20   : > { %2168 = vmatpush3.bf16.msra.mxu0 %v2279_v21  ;;  %v1082_v57 = vld [vmem:[%s2542_s11 + $0x48] sm:$0xff]  ;;  %v1081_v58 = vld [vmem:[%s2542_s11 + $0x40] sm:$0xff]  ;;  %v1084_v61 = vld [vmem:[%s2542_s11 + $0x58] sm:$0xff] }
  0x21   : > { %420 = vperm.xlu1 %2270, %v367_v15   ;;  %417 = vperm.xlu0 %2269, %v366_v16   ;;  %v1098_v59 = vld [vmem:[%s2542_s11 + $0xc8] sm:$0xff]  ;;  %v1097_v60 = vld [vmem:[%s2542_s11 + $0xc0] sm:$0xff]  ;;  %v1083_v62 = vld [vmem:[%s2542_s11 + $0x50] sm:$0xff]  ;;  %v2586_v16 = vand.u32 127, %v3103_v12 }
  0x22   : > { %2169 = vmatprep.subr.bf16.mxu0 %v2280_v22  ;;  %v1100_v63 = vld [vmem:[%s2542_s11 + $0xd8] sm:$0xff]  ;;  %v1099_v1 = vld [vmem:[%s2542_s11 + $0xd0] sm:$0xff]  ;;  %v1086_v2 = vld [vmem:[%s2542_s11 + $0x68] sm:$0xff] }
  0x23   : > { %v1085_v3 = vld [vmem:[%s2542_s11 + $0x60] sm:$0xff]  ;;  %v1102_v4 = vld [vmem:[%s2542_s11 + $0xe8] sm:$0xff]  ;;  %v1088_v6 = vld [vmem:[%s2542_s11 + $0x78] sm:$0xff] }
  0x24   : > { %2170 = vmatpush3.bf16.msra.mxu0 %v2280_v22  ;;  %v1101_v5 = vld [vmem:[%s2542_s11 + $0xe0] sm:$0xff]  ;;  %v1087_v7 = vld [vmem:[%s2542_s11 + $0x70] sm:$0xff]  ;;  %v1104_v8 = vld [vmem:[%s2542_s11 + $0xf8] sm:$0xff] }
  0x25   : > { %426 = vperm.xlu1 %2270, %v369_v17   ;;  %423 = vperm.xlu0 %2269, %v368_v18   ;;  %v1103_v9 = vld [vmem:[%s2542_s11 + $0xf0] sm:$0xff]  ;;  %v2281_v10 = vld [vmem:[%s3098_s4] sm:$0xff]   ;;  %v2282_v11 = vld [vmem:[%s3098_s4 + $0x8] sm:$0xff]  }
  0x26   : > { %2203 = vmatprep.subr.bf16.mxu1 %v2281_v10  ;;  %v2283_v15 = vld [vmem:[%s3098_s4 + $0x10] sm:$0xff]  }
  0x27   : > { %2204 = vmatpush3.bf16.msra.mxu1 %v2281_v10 }
  0x28   : > { %2205 = vmatprep.subr.bf16.mxu1 %v2282_v11 }
  0x29   : > { %432 = vperm.xlu1 %2270, %v371_v19   ;;  %429 = vperm.xlu0 %2269, %v370_v20   ;;  %v2284_v19 = vld [vmem:[%s3098_s4 + $0x18] sm:$0xff]   ;;  %v2410_v20 = vmov 1.0|1.0  }
  0x2b   : > { %2206 = vmatpush3.bf16.msra.mxu1 %v2282_v11 }
  0x2c   : > { %2207 = vmatprep.subr.bf16.mxu1 %v2283_v15 }
  0x2d   : > { %438 = vperm.xlu1 %2270, %v373_v23   ;;  %435 = vperm.xlu0 %2269, %v372_v24   ;;  %v2285_v23 = vld [vmem:[%s3098_s4 + $0x20] sm:$0xff]  }
  0x2f   : > { %2208 = vmatpush3.bf16.msra.mxu1 %v2283_v15 }
  0x30   : > { %2209 = vmatprep.subr.bf16.mxu1 %v2284_v19 }
  0x31   : > { %444 = vperm.xlu1 %2270, %v375_v25   ;;  %441 = vperm.xlu0 %2269, %v374_v26   ;;  %v2286_v26 = vld [vmem:[%s3098_s4 + $0x28] sm:$0xff]  }
  0x33   : > { %2210 = vmatpush3.bf16.msra.mxu1 %v2284_v19 }
  0x34   : > { %2211 = vmatprep.subr.bf16.mxu1 %v2285_v23 }
  0x35   : > { %450 = vperm.xlu1 %2270, %v377_v27   ;;  %447 = vperm.xlu0 %2269, %v376_v28  }
  0x37   : > { %2212 = vmatpush3.bf16.msra.mxu1 %v2285_v23 }
  0x38   : > { %2213 = vmatprep.subr.bf16.mxu1 %v2286_v26 }
  0x39   : > { %456 = vperm.xlu1 %2270, %v379_v29   ;;  %453 = vperm.xlu0 %2269, %v378_v30   ;;  %v2287_v29 = vld [vmem:[%s3098_s4 + $0x30] sm:$0xff]  }
  0x3b   : > { %2214 = vmatpush3.bf16.msra.mxu1 %v2286_v26 }
  0x3c   : > { %2215 = vmatprep.subr.bf16.mxu1 %v2287_v29 }
  0x3d   : > { %462 = vperm.xlu1 %2270, %v381_v31   ;;  %459 = vperm.xlu0 %2269, %v380_v32  }
  0x3f   : > { %2216 = vmatpush3.bf16.msra.mxu1 %v2287_v29 }
  0x41   : > { %468 = vperm.xlu1 %2270, %v383_v33   ;;  %465 = vperm.xlu0 %2269, %v382_v34  }
  0x45   : > { %474 = vperm.xlu1 %2270, %v385_v35   ;;  %471 = vperm.xlu0 %2269, %v384_v36  }
  0x49   : > { %480 = vperm.xlu1 %2270, %v387_v37   ;;  %477 = vperm.xlu0 %2269, %v386_v38  }
  0x4d   : > { %486 = vperm.xlu1 %2270, %v389_v39   ;;  %483 = vperm.xlu0 %2269, %v388_v40  }
  0x51   : > { %1122 = vperm.xlu1 %2270, %v1076_v41   ;;  %1117 = vperm.xlu0 %2269, %v1075_v42  }
  0x55   : > { %1202 = vperm.xlu1 %2270, %v1092_v43   ;;  %1197 = vperm.xlu0 %2269, %v1091_v44  }
  0x59   : > { %1132 = vperm.xlu1 %2270, %v1078_v45   ;;  %1127 = vperm.xlu0 %2269, %v1077_v46  }
  0x5d   : > { %1212 = vperm.xlu1 %2270, %v1094_v47   ;;  %1207 = vperm.xlu0 %2269, %v1093_v48  }
  0x61   : > { %1112 = vperm.xlu1 %2270, %v1074_v49   ;;  %1107 = vperm.xlu0 %2269, %v1073_v50  }
  0x65   : > { %1142 = vperm.xlu1 %2270, %v1080_v51   ;;  %1137 = vperm.xlu0 %2269, %v1079_v52   ;;  %v2288_v52 = vld [vmem:[%s3098_s4 + $0x38] sm:$0xff]  }
  0x66   : > { %2217 = vmatprep.subr.bf16.mxu1 %v2288_v52 }
  0x67   : > { %2218 = vmatpush3.bf16.msra.mxu1 %v2288_v52 }
  0x69   : > { %1192 = vperm.xlu1 %2270, %v1090_v53   ;;  %1187 = vperm.xlu0 %2269, %v1089_v54   ;;  %v2411_v53 = vmov 127   ;;  %v357_v54 = vld [vmem:[%s2656_s29 + $0x18] sm:$0xff] }
  0x6d   : > { %1222 = vperm.xlu1 %2270, %v1096_v55   ;;  %1217 = vperm.xlu0 %2269, %v1095_v56  }
  0x71   : > { %1152 = vperm.xlu1 %2270, %v1082_v57   ;;  %1147 = vperm.xlu0 %2269, %v1081_v58  }
  0x75   : > { %1232 = vperm.xlu1 %2270, %v1098_v59   ;;  %1227 = vperm.xlu0 %2269, %v1097_v60  }
  0x79   : > { %1162 = vperm.xlu1 %2270, %v1084_v61   ;;  %1157 = vperm.xlu0 %2269, %v1083_v62  }
  0x7d   : > { %1242 = vperm.xlu1 %2270, %v1100_v63   ;;  %1237 = vperm.xlu0 %2269, %v1099_v1  }
  0x81   : > { %1172 = vperm.xlu1 %2270, %v1086_v2   ;;  %1167 = vperm.xlu0 %2269, %v1085_v3  }
  0x85   : > { %1252 = vperm.xlu1 %2270, %v1102_v4   ;;  %1247 = vperm.xlu0 %2269, %v1101_v5  }
  0x89   : > { %1182 = vperm.xlu1 %2270, %v1088_v6   ;;  %1177 = vperm.xlu0 %2269, %v1087_v7  }
  0x8d   : > { %1262 = vperm.xlu1 %2270, %v1104_v8   ;;  %1257 = vperm.xlu0 %2269, %v1103_v9  }
  0x90   : > { %v400_v13 = vpop.permute.xlu1 %399  ;;  %v394_v14 = vpop.permute.xlu0 %393 }
  0x91   : > { %vm490_vm0 = vcmp.eq.s32.totalorder %v2586_v16, %v400_v13  ;;  %vm488_vm3 = vcmp.eq.s32.totalorder %v2586_v16, %v394_v14  ;;  %2271 = vset.pattern.permute.xlu0 %v2411_v53  ;;  %2272 = vset.pattern.permute.xlu1 %v2411_v53  ;;  %v2292_v53 = vld [vmem:[%s3100_s6 + $0x10] ss:$8 sps:$4 sm:$0xff]  }
  0x92   : > { %1415 = vperm.xlu1 %2272, %v357_v54  }
  0x94   : > { %v403_v17 = vpop.permute.xlu1 %402  ;;  %v397_v18 = vpop.permute.xlu0 %396 }
  0x95   : > { %vm491_vm1 = vcmp.eq.s32.totalorder %v2586_v16, %v403_v17  ;;  %vm489_vm2 = vcmp.eq.s32.totalorder %v2586_v16, %v397_v18 }
  0x96   : > { %vm2047_vm4 = vmpackc.low %vm491_vm1, %vm490_vm0 }
  0x97   : > { %vm2045_vm5 = vmpackc.low %vm489_vm2, %vm488_vm3 }
  0x98   : > { %2171 = vmatprep.mubr.msk.bf16.mxu0 %vm2045_vm5, %v2410_v20  ;;  %v409_v21 = vpop.permute.xlu1 %408  ;;  %v406_v22 = vpop.permute.xlu0 %405 }
  0x99   : > { %vm493_vm6 = vcmp.eq.s32.totalorder %v2586_v16, %v409_v21  ;;  %2172 = vmatmul.mubr.msk.bf16.vlgmr.msra.gmra.mrb[0].mxu0 %vm2047_vm4, %v2410_v20  ;;  %vm492_vm7 = vcmp.eq.s32.totalorder %v2586_v16, %v406_v22 }
  0x9a   : > { %vm2049_vm8 = vmpackc.low %vm493_vm6, %vm492_vm7 }
  0x9b   : > { %2175 = vmatprep.mubr.msk.bf16.mxu0 %vm2049_vm8, %v2410_v20 }
  0x9c   : > { %v415_v24 = vpop.permute.xlu1 %414  ;;  %v412_v25 = vpop.permute.xlu0 %411 }
  0x9d   : > { %vm495_vm9 = vcmp.eq.s32.totalorder %v2586_v16, %v415_v24  ;;  %vm494_vm10 = vcmp.eq.s32.totalorder %v2586_v16, %v412_v25 }
  0x9e   : > { %vm2051_vm11 = vmpackc.low %vm495_vm9, %vm494_vm10 }
  0xa0   : > { %v421_v27 = vpop.permute.xlu1 %420  ;;  %v418_v28 = vpop.permute.xlu0 %417 }
  0xa1   : > { %vm497_vm12 = vcmp.eq.s32.totalorder %v2586_v16, %v421_v27  ;;  %2176 = vmatmul.mubr.msk.bf16.gmra.mrb[4].mxu0 %vm2051_vm11, %v2410_v20  ;;  %vm496_vm13 = vcmp.eq.s32.totalorder %v2586_v16, %v418_v28 }
  0xa2   : > { %vm2053_vm14 = vmpackc.low %vm497_vm12, %vm496_vm13 }
  0xa3   : > { %2179 = vmatprep.mubr.msk.bf16.mxu0 %vm2053_vm14, %v2410_v20 }
  0xa4   : > { %v427_v30 = vpop.permute.xlu1 %426  ;;  %v424_v31 = vpop.permute.xlu0 %423 }
  0xa5   : > { %vm499_vm15 = vcmp.eq.s32.totalorder %v2586_v16, %v427_v30  ;;  %vm498_vm0 = vcmp.eq.s32.totalorder %v2586_v16, %v424_v31 }
  0xa6   : > { %vm2055_vm1 = vmpackc.low %vm499_vm15, %vm498_vm0 }
  0xa8   : > { %v433_v32 = vpop.permute.xlu1 %432  ;;  %v430_v33 = vpop.permute.xlu0 %429 }
  0xa9   : > { %vm501_vm2 = vcmp.eq.s32.totalorder %v2586_v16, %v433_v32  ;;  %2180 = vmatmul.mubr.msk.bf16.gmra.mrb[8].mxu0 %vm2055_vm1, %v2410_v20  ;;  %vm500_vm3 = vcmp.eq.s32.totalorder %v2586_v16, %v430_v33 }
  0xaa   : > { %vm2057_vm4 = vmpackc.low %vm501_vm2, %vm500_vm3 }
  0xab   : > { %2183 = vmatprep.mubr.msk.bf16.mxu0 %vm2057_vm4, %v2410_v20 }
  0xac   : > { %v439_v34 = vpop.permute.xlu1 %438  ;;  %v436_v35 = vpop.permute.xlu0 %435 }
  0xad   : > { %vm503_vm5 = vcmp.eq.s32.totalorder %v2586_v16, %v439_v34  ;;  %vm502_vm6 = vcmp.eq.s32.totalorder %v2586_v16, %v436_v35 }
  0xae   : > { %vm2059_vm7 = vmpackc.low %vm503_vm5, %vm502_vm6 }
  0xb0   : > { %v445_v36 = vpop.permute.xlu1 %444  ;;  %v442_v37 = vpop.permute.xlu0 %441 }
  0xb1   : > { %vm505_vm8 = vcmp.eq.s32.totalorder %v2586_v16, %v445_v36  ;;  %2184 = vmatmul.mubr.msk.bf16.gmra.mrb[12].mxu0 %vm2059_vm7, %v2410_v20  ;;  %vm504_vm9 = vcmp.eq.s32.totalorder %v2586_v16, %v442_v37 }
  0xb2   : > { %vm2061_vm10 = vmpackc.low %vm505_vm8, %vm504_vm9 }
  0xb3   : > { %2187 = vmatprep.mubr.msk.bf16.mxu0 %vm2061_vm10, %v2410_v20 }
  0xb4   : > { %v451_v38 = vpop.permute.xlu1 %450  ;;  %v448_v39 = vpop.permute.xlu0 %447 }
  0xb5   : > { %vm507_vm11 = vcmp.eq.s32.totalorder %v2586_v16, %v451_v38  ;;  %vm506_vm12 = vcmp.eq.s32.totalorder %v2586_v16, %v448_v39 }
  0xb6   : > { %vm2063_vm13 = vmpackc.low %vm507_vm11, %vm506_vm12 }
  0xb8   : > { %v457_v40 = vpop.permute.xlu1 %456  ;;  %v454_v41 = vpop.permute.xlu0 %453 }
  0xb9   : > { %vm509_vm14 = vcmp.eq.s32.totalorder %v2586_v16, %v457_v40  ;;  %2188 = vmatmul.mubr.msk.bf16.gmra.mrb[16].mxu0 %vm2063_vm13, %v2410_v20  ;;  %vm508_vm15 = vcmp.eq.s32.totalorder %v2586_v16, %v454_v41 }
  0xba   : > { %vm2065_vm0 = vmpackc.low %vm509_vm14, %vm508_vm15 }
  0xbb   : > { %2191 = vmatprep.mubr.msk.bf16.mxu0 %vm2065_vm0, %v2410_v20  ;;  %vm1480_vm0 = vcmask 1041409  }
  0xbc   : > { %v463_v42 = vpop.permute.xlu1 %462  ;;  %v460_v43 = vpop.permute.xlu0 %459 }
  0xbd   : > { %vm511_vm1 = vcmp.eq.s32.totalorder %v2586_v16, %v463_v42  ;;  %vm510_vm2 = vcmp.eq.s32.totalorder %v2586_v16, %v460_v43 }
  0xbe   : > { %vm2067_vm3 = vmpackc.low %vm511_vm1, %vm510_vm2  ;;  %vm1483_vm1 = vcmask 1042434   ;;  %vm1486_vm2 = vcmask 1043459  }
  0xc0   : > { %v469_v44 = vpop.permute.xlu1 %468  ;;  %v466_v45 = vpop.permute.xlu0 %465 }
  0xc1   : > { %vm513_vm4 = vcmp.eq.s32.totalorder %v2586_v16, %v469_v44  ;;  %2192 = vmatmul.mubr.msk.bf16.gmra.mrb[20].mxu0 %vm2067_vm3, %v2410_v20  ;;  %vm512_vm5 = vcmp.eq.s32.totalorder %v2586_v16, %v466_v45  ;;  %vm1489_vm3 = vcmask 1044484  }
  0xc2   : > { %vm2069_vm6 = vmpackc.low %vm513_vm4, %vm512_vm5  ;;  %vm1492_vm4 = vcmask 1045509   ;;  %vm1495_vm5 = vcmask 1046534  }
  0xc3   : > { %2195 = vmatprep.mubr.msk.bf16.mxu0 %vm2069_vm6, %v2410_v20  ;;  %vm1498_vm6 = vcmask 1047559  }
  0xc4   : > { %v475_v46 = vpop.permute.xlu1 %474  ;;  %v472_v47 = vpop.permute.xlu0 %471 }
  0xc5   : > { %vm515_vm7 = vcmp.eq.s32.totalorder %v2586_v16, %v475_v46  ;;  %vm514_vm8 = vcmp.eq.s32.totalorder %v2586_v16, %v472_v47 }
  0xc6   : > { %vm2071_vm9 = vmpackc.low %vm515_vm7, %vm514_vm8  ;;  %vm1870_vm7 = vcmp.lt.s32.totalorder %v2586_v16, 8 }
  0xc8   : > { %v481_v48 = vpop.permute.xlu1 %480  ;;  %v478_v49 = vpop.permute.xlu0 %477 }
  0xc9   : > { %vm517_vm10 = vcmp.eq.s32.totalorder %v2586_v16, %v481_v48  ;;  %2196 = vmatmul.mubr.msk.bf16.gmra.mrb[24].mxu0 %vm2071_vm9, %v2410_v20  ;;  %vm516_vm11 = vcmp.eq.s32.totalorder %v2586_v16, %v478_v49  ;;  %v2289_v48 = vld [vmem:[%s3100_s6] ss:$8 sps:$4 sm:$0xff]   ;;  %v2291_v49 = vld [vmem:[%s3100_s6 + $0x4] ss:$8 sps:$4 sm:$0xff]  }
  0xca   : > { %vm2073_vm12 = vmpackc.low %vm517_vm10, %vm516_vm11  ;;  %1798 = vmatprep.subr.bf16.mxu0 %v2291_v49 }
  0xcb   : > { %2199 = vmatprep.mubr.msk.bf16.mxu0 %vm2073_vm12, %v2410_v20  ;;  %1799 = vmatpush1.bf16.msra.mxu0 %v2289_v48  ;;  %vm1601_vm12 = vcmask 7168  }
  0xcc   : > { %v487_v50 = vpop.permute.xlu1 %486  ;;  %v484_v51 = vpop.permute.xlu0 %483 }
  0xcd   : > { %vm519_vm13 = vcmp.eq.s32.totalorder %v2586_v16, %v487_v50  ;;  %vm518_vm14 = vcmp.eq.s32.totalorder %v2586_v16, %v484_v51 }
  0xce   : > { %vm2075_vm15 = vmpackc.low %vm519_vm13, %vm518_vm14 }
  0xd0   : > { %v2660_v42 = vpop.permute.xlu0 %1117  ;;  %v2662_v43 = vpop.permute.xlu1 %1122 }
  0xd1   : > { %2200 = vmatmul.mubr.msk.bf16.gmra.mrb[28].mxu0 %vm2075_vm15, %v2410_v20 }
  0xd2   : > { %1830 = vmatprep.mubr.bf16.mxu0 %v2409_v0  ;;  %v355_v0 = vld [vmem:[%s2656_s29 + $0x8] sm:$0xff] }
  0xd3   : > { %1411 = vperm.xlu0 %2271, %v355_v0   ;;  %v2294_v0 = vld [vmem:[%s3100_s6 + $0x14] ss:$8 sps:$4 sm:$0xff]  }
  0xd4   : > { %v2664_v44 = vpop.permute.xlu0 %1197  ;;  %v2666_v45 = vpop.permute.xlu1 %1202  ;;  %1800 = vmatprep.subr.bf16.mxu0 %v2294_v0 }
  0xd5   : > { %1801 = vmatpush1.bf16.msra.mxu0 %v2292_v53 }
  0xd8   : > { %v2668_v46 = vpop.permute.xlu0 %1127  ;;  %v2670_v47 = vpop.permute.xlu1 %1132 }
  0xdc   : > { %v2678_v50 = vpop.permute.xlu0 %1207  ;;  %v2680_v51 = vpop.permute.xlu1 %1212 }
  0xe0   : > { %v2682_v52 = vpop.permute.xlu0 %1107  ;;  %v2690_v54 = vpop.permute.xlu1 %1112 }
 0x16c   : > { %v2173_v55 = vpop.f32.mrb[0].mxu0 }
 0x16d   : > { %v666_v56 = vpop.f32.mrb[1].mxu0 }
 0x16e   : > { %v2174_v57 = vpop.f32.mrb[2].mxu0 }
 0x16f   : > { %v794_v58 = vpack.c.bf16 %v2174_v57, %v2173_v55  ;;  %v669_v59 = vpop.f32.mrb[3].mxu0  ;;  %v2295_v55 = vld [vmem:[%s3100_s6 + $0x20] ss:$8 sps:$4 sm:$0xff]   ;;  %v2698_v57 = vpop.permute.xlu0 %1137 }
 0x170   : > { %v793_v60 = vpack.c.bf16 %v669_v59, %v666_v56  ;;  %v2297_v56 = vld [vmem:[%s3100_s6 + $0x24] ss:$8 sps:$4 sm:$0xff]   ;;  %v2300_v59 = vld [vmem:[%s3100_s6 + $0x34] ss:$8 sps:$4 sm:$0xff]  }
 0x171   : > { %1802 = vmatprep.subr.bf16.mxu0 %v2297_v56 }
 0x172   : > { %2219 = vmatprep.mubr.bf16.mxu1 %v793_v60  ;;  %1803 = vmatpush1.bf16.msra.mxu0 %v2295_v55  ;;  %v2298_v60 = vld [vmem:[%s3100_s6 + $0x30] ss:$8 sps:$4 sm:$0xff]  }
 0x173   : > { %2220 = vmatmul.mubr.bf16.vlgmr.msra.gmra.mrb[0].mxu1 %v794_v58  ;;  %v2700_v58 = vpop.permute.xlu1 %1142  ;;  %1804 = vmatprep.subr.bf16.mxu0 %v2300_v59 }
 0x174   : > { %v2177_v61 = vpop.f32.mrb[4].mxu0 }
 0x175   : > { %v682_v62 = vpop.f32.mrb[5].mxu0 }
 0x176   : > { %v2178_v63 = vpop.f32.mrb[6].mxu0  ;;  %1805 = vmatpush1.bf16.msra.mxu0 %v2298_v60 }
 0x177   : > { %v796_v1 = vpack.c.bf16 %v2178_v63, %v2177_v61  ;;  %v685_v2 = vpop.f32.mrb[7].mxu0  ;;  %v2708_v61 = vpop.permute.xlu0 %1187 }
 0x178   : > { %v795_v3 = vpack.c.bf16 %v685_v2, %v682_v62  ;;  %v2303_v62 = vld [vmem:[%s3100_s6 + $0x44] ss:$8 sps:$4 sm:$0xff]   ;;  %v2713_v63 = vpop.permute.xlu1 %1192  ;;  %v2306_v2 = vld [vmem:[%s3100_s6 + $0x54] ss:$8 sps:$4 sm:$0xff]  }
 0x179   : > { %1806 = vmatprep.subr.bf16.mxu0 %v2303_v62 }
 0x17a   : > { %2223 = vmatprep.mubr.bf16.mxu1 %v795_v3  ;;  %v2304_v3 = vld [vmem:[%s3100_s6 + $0x50] ss:$8 sps:$4 sm:$0xff]  }
 0x17b   : > { %2224 = vmatmul.mubr.bf16.gmra.mrb[4].mxu1 %v796_v1  ;;  %v2301_v1 = vld [vmem:[%s3100_s6 + $0x40] ss:$8 sps:$4 sm:$0xff]  }
 0x17c   : > { %v2181_v4 = vpop.f32.mrb[8].mxu0  ;;  %1807 = vmatpush1.bf16.msra.mxu0 %v2301_v1 }
 0x17d   : > { %v698_v5 = vpop.f32.mrb[9].mxu0  ;;  %1808 = vmatprep.subr.bf16.mxu0 %v2306_v2 }
 0x17e   : > { %v2182_v6 = vpop.f32.mrb[10].mxu0 }
 0x17f   : > { %v798_v7 = vpack.c.bf16 %v2182_v6, %v2181_v4  ;;  %v701_v8 = vpop.f32.mrb[11].mxu0  ;;  %v2724_v4 = vpop.permute.xlu0 %1217 }
 0x180   : > { %v797_v9 = vpack.c.bf16 %v701_v8, %v698_v5  ;;  %v2309_v5 = vld [vmem:[%s3100_s6 + $0x64] ss:$8 sps:$4 sm:$0xff]   ;;  %v2729_v6 = vpop.permute.xlu1 %1222  ;;  %1809 = vmatpush1.bf16.msra.mxu0 %v2304_v3  ;;  %v2312_v8 = vld [vmem:[%s3100_s6 + $0x74] ss:$8 sps:$4 sm:$0xff]  }
 0x181   : > { %1810 = vmatprep.subr.bf16.mxu0 %v2309_v5 }
 0x182   : > { %2227 = vmatprep.mubr.bf16.mxu1 %v797_v9 }
 0x183   : > { %2228 = vmatmul.mubr.bf16.gmra.mrb[8].mxu1 %v798_v7  ;;  %v2307_v7 = vld [vmem:[%s3100_s6 + $0x60] ss:$8 sps:$4 sm:$0xff]   ;;  %v2737_v9 = vpop.permute.xlu0 %1147 }
 0x184   : > { %v2185_v10 = vpop.f32.mrb[12].mxu0  ;;  %1811 = vmatpush1.bf16.msra.mxu0 %v2307_v7 }
 0x185   : > { %v714_v11 = vpop.f32.mrb[13].mxu0  ;;  %1812 = vmatprep.subr.bf16.mxu0 %v2312_v8 }
 0x186   : > { %v2186_v13 = vpop.f32.mrb[14].mxu0 }
 0x187   : > { %v800_v14 = vpack.c.bf16 %v2186_v13, %v2185_v10  ;;  %v717_v15 = vpop.f32.mrb[15].mxu0  ;;  %v2310_v10 = vld [vmem:[%s3100_s6 + $0x70] ss:$8 sps:$4 sm:$0xff]   ;;  %v2744_v13 = vpop.permute.xlu0 %1227 }
 0x188   : > { %v799_v17 = vpack.c.bf16 %v717_v15, %v714_v11  ;;  %v2742_v11 = vpop.permute.xlu1 %1152  ;;  %1813 = vmatpush1.bf16.msra.mxu0 %v2310_v10 }
 0x18a   : > { %2231 = vmatprep.mubr.bf16.mxu1 %v799_v17 }
 0x18b   : > { %2232 = vmatmul.mubr.bf16.gmra.mrb[12].mxu1 %v800_v14  ;;  %v2748_v15 = vpop.permute.xlu0 %1157 }
 0x18c   : > { %v2189_v18 = vpop.f32.mrb[16].mxu0  ;;  %v2746_v14 = vpop.permute.xlu1 %1232 }
 0x18d   : > { %v730_v19 = vpop.f32.mrb[17].mxu0 }
 0x18e   : > { %v2190_v20 = vpop.f32.mrb[18].mxu0 }
 0x18f   : > { %v802_v21 = vpack.c.bf16 %v2190_v20, %v2189_v18  ;;  %v733_v22 = vpop.f32.mrb[19].mxu0  ;;  %v2752_v18 = vpop.permute.xlu0 %1237 }
 0x190   : > { %v801_v23 = vpack.c.bf16 %v733_v22, %v730_v19  ;;  %v2750_v17 = vpop.permute.xlu1 %1162  ;;  %v2763_v22 = vld [vmem:[%s3099_s5] ss:$0 sm:$0xff] }
 0x192   : > { %2235 = vmatprep.mubr.bf16.mxu1 %v801_v23 }
 0x193   : > { %2236 = vmatmul.mubr.bf16.gmra.mrb[16].mxu1 %v802_v21  ;;  %v2756_v20 = vpop.permute.xlu0 %1167 }
 0x194   : > { %v2193_v24 = vpop.f32.mrb[20].mxu0  ;;  %v2754_v19 = vpop.permute.xlu1 %1242 }
 0x195   : > { %v746_v25 = vpop.f32.mrb[21].mxu0 }
 0x196   : > { %v2194_v26 = vpop.f32.mrb[22].mxu0 }
 0x197   : > { %v804_v27 = vpack.c.bf16 %v2194_v26, %v2193_v24  ;;  %v749_v28 = vpop.f32.mrb[23].mxu0  ;;  %v2765_v23 = vpop.permute.xlu0 %1247 }
 0x198   : > { %v803_v29 = vpack.c.bf16 %v749_v28, %v746_v25  ;;  %v2758_v21 = vpop.permute.xlu1 %1172 }
 0x19a   : > { %2239 = vmatprep.mubr.bf16.mxu1 %v803_v29 }
 0x19b   : > { %2240 = vmatmul.mubr.bf16.gmra.mrb[20].mxu1 %v804_v27 }
 0x19c   : > { %v2197_v30 = vpop.f32.mrb[24].mxu0  ;;  %v2769_v29 = vpop.permute.xlu1 %1252 }
 0x19d   : > { %v762_v31 = vpop.f32.mrb[25].mxu0 }
 0x19e   : > { %v2198_v32 = vpop.f32.mrb[26].mxu0 }
 0x19f   : > { %v806_v33 = vpack.c.bf16 %v2198_v32, %v2197_v30  ;;  %v765_v34 = vpop.f32.mrb[27].mxu0 }
 0x1a0   : > { %v805_v35 = vpack.c.bf16 %v765_v34, %v762_v31 }
 0x1a2   : > { %2243 = vmatprep.mubr.bf16.mxu1 %v805_v35  ;;  %v2775_v35 = vpop.permute.xlu1 %1182 }
 0x1a3   : > { %2244 = vmatmul.mubr.bf16.gmra.mrb[24].mxu1 %v806_v33  ;;  %v2773_v33 = vpop.permute.xlu0 %1177 }
 0x1a4   : > { %v2201_v36 = vpop.f32.mrb[28].mxu0 }
 0x1a5   : > { %v778_v37 = vpop.f32.mrb[29].mxu0 }
 0x1a6   : > { %v2202_v38 = vpop.f32.mrb[30].mxu0  ;;  %v2783_v56 = vpop.permute.xlu1 %1262 }
 0x1a7   : > { %v808_v39 = vpack.c.bf16 %v2202_v38, %v2201_v36  ;;  %v781_v40 = vpop.f32.mrb[31].mxu0  ;;  %v2780_v48 = vpop.permute.xlu0 %1257 }
 0x1a8   : > { %v807_v41 = vpack.c.bf16 %v781_v40, %v778_v37 }
 0x1aa   : > { %2247 = vmatprep.mubr.bf16.mxu1 %v807_v41 }
 0x1ab   : > { %2248 = vmatmul.mubr.bf16.gmra.mrb[28].mxu1 %v808_v39  ;;  %v2787_v2 = vpop.permute.xlu0 %1411 }
 0x246   : > { %v2221_v24 = vpop.f32.mrb[0].mxu1 }
 0x247   : > { %v923_v25 = vadd.f32 %v2221_v24, %v2763_v22  ;;  %v914_v26 = vpop.f32.mrb[1].mxu1 }
 0x248   : > { %v915_v27 = vadd.f32 %v2763_v22, %v914_v26  ;;  %v2222_v28 = vpop.f32.mrb[2].mxu1 }
 0x249   : > { %2313 = vtanh.f32 %v923_v25  ;;  %v926_v30 = vadd.f32 %v2222_v28, %v2763_v22  ;;  %v917_v31 = vpop.f32.mrb[3].mxu1 }
 0x24a   : > { %2315 = vtanh.f32 %v915_v27  ;;  %v918_v32 = vadd.f32 %v2763_v22, %v917_v31 }
 0x24b   : > { %2317 = vtanh.f32 %v926_v30  ;;  %v2797_v30 = vpop.permute.xlu1 %1415 }
 0x24c   : > { %2319 = vtanh.f32 %v918_v32 }
 0x24e   : > { %v2225_v34 = vpop.f32.mrb[4].mxu1 }
 0x24f   : > { %v939_v36 = vadd.f32 %v2225_v34, %v2763_v22  ;;  %v930_v37 = vpop.f32.mrb[5].mxu1  ;;  %v1418_v34 = vrot.slane %v2787_v2, 2 }
 0x250   : > { %v931_v38 = vadd.f32 %v2763_v22, %v930_v37  ;;  %v2226_v39 = vpop.f32.mrb[6].mxu1 }
 0x251   : > { %2321 = vtanh.f32 %v939_v36  ;;  %v942_v40 = vadd.f32 %v2226_v39, %v2763_v22  ;;  %v933_v41 = vpop.f32.mrb[7].mxu1  ;;  %v1421_v36 = vrot.slane %v2787_v2, 5  ;;  %v1420_v39 = vrot.slane %v2787_v2, 4 }
 0x252   : > { %2323 = vtanh.f32 %v931_v38  ;;  %v934_v49 = vadd.f32 %v2763_v22, %v933_v41 }
 0x253   : > { %v2314_v53 = vpop.eup %2313  ;;  %2325 = vtanh.f32 %v942_v40  ;;  %v1423_v40 = vrot.slane %v2787_v2, 7 }
 0x254   : > { %v2316_v0 = vpop.eup %2315  ;;  %2327 = vtanh.f32 %v934_v49  ;;  %v1267_v60 = vmul.f32 %v2314_v53, %v2660_v42  ;;  %v1422_v53 = vrot.slane %v2787_v2, 6 }
 0x255   : > { %v2318_v55 = vpop.eup %2317  ;;  %v1265_v3 = vmul.f32 %v2316_v0, %v2682_v52  ;;  %v1424_v0 = vrot.slane %v2797_v30, 1 }
 0x256   : > { %v2320_v59 = vpop.eup %2319  ;;  %v1268_v62 = vmul.f32 %v2318_v55, %v2662_v43  ;;  %v2229_v1 = vpop.f32.mrb[8].mxu1  ;;  %v1417_v43 = vrot.slane %v2787_v2, 1  ;;  %v1426_v55 = vrot.slane %v2797_v30, 3 }
 0x257   : > { %v1266_v5 = vmul.f32 %v2320_v59, %v2690_v54  ;;  %v955_v7 = vadd.f32 %v2229_v1, %v2763_v22  ;;  %v946_v8 = vpop.f32.mrb[9].mxu1  ;;  %v1419_v54 = vrot.slane %v2787_v2, 3 }
 0x258   : > { %v1304_v10 = vadd.f32 %v1268_v62, %v1267_v60  ;;  %v947_v24 = vadd.f32 %v2763_v22, %v946_v8  ;;  %v2230_v25 = vpop.f32.mrb[10].mxu1 }
 0x259   : > { %v1297_v26 = vadd.f32 %v1266_v5, %v1265_v3  ;;  %2329 = vtanh.f32 %v955_v7  ;;  %v958_v42 = vadd.f32 %v2230_v25, %v2763_v22  ;;  %v949_v27 = vpop.f32.mrb[11].mxu1  ;;  %v1425_v5 = vrot.slane %v2797_v30, 2 }
 0x25a   : > { %v1305_v28 = vrot.slane %v1304_v10, 4  ;;  %2331 = vtanh.f32 %v947_v24  ;;  %v950_v52 = vadd.f32 %v2763_v22, %v949_v27 }
 0x25b   : > { %v2322_v31 = vpop.eup %2321  ;;  %v1298_v32 = vrot.slane %v1297_v26, 4  ;;  %2333 = vtanh.f32 %v958_v42 }
 0x25c   : > { %v2324_v37 = vpop.eup %2323  ;;  %v1306_v38 = vadd.f32 %v1305_v28, %v1304_v10  ;;  %2335 = vtanh.f32 %v950_v52  ;;  %v1271_v62 = vmul.f32 %v2322_v31, %v2698_v57  ;;  %v1428_v57 = vrot.slane %v2797_v30, 5 }
 0x25d   : > { %v2326_v41 = vpop.eup %2325  ;;  %v1299_v49 = vadd.f32 %v1298_v32, %v1297_v26  ;;  %v1269_v8 = vmul.f32 %v2324_v37, %v2668_v46 }
 0x25e   : > { %v2328_v59 = vpop.eup %2327  ;;  %v1307_v60 = vrot.slane %v1306_v38, 2  ;;  %v1272_v1 = vmul.f32 %v2326_v41, %v2700_v58  ;;  %v2233_v3 = vpop.f32.mrb[12].mxu1 }
 0x25f   : > { %v1300_v7 = vrot.slane %v1299_v49, 2  ;;  %v1270_v10 = vmul.f32 %v2328_v59, %v2670_v47  ;;  %v971_v24 = vadd.f32 %v2233_v3, %v2763_v22  ;;  %v962_v25 = vpop.f32.mrb[13].mxu1 }
 0x260   : > { %v1308_v26 = vadd.f32 %v1307_v60, %v1306_v38  ;;  %v1318_v42 = vadd.f32 %v1272_v1, %v1271_v62  ;;  %v963_v27 = vadd.f32 %v2763_v22, %v962_v25  ;;  %v2234_v28 = vpop.f32.mrb[14].mxu1  ;;  %v1427_v60 = vrot.slane %v2797_v30, 4 }
 0x261   : > { %v1301_v52 = vadd.f32 %v1300_v7, %v1299_v49  ;;  %v1311_v58 = vadd.f32 %v1270_v10, %v1269_v8  ;;  %2337 = vtanh.f32 %v971_v24  ;;  %v974_v31 = vadd.f32 %v2234_v28, %v2763_v22  ;;  %v965_v32 = vpop.f32.mrb[15].mxu1 }
 0x262   : > { %v1309_v41 = vrot.slane %v1308_v26, 1  ;;  %v1319_v46 = vrot.slane %v1318_v42, 4  ;;  %2339 = vtanh.f32 %v963_v27  ;;  %v966_v47 = vadd.f32 %v2763_v22, %v965_v32 }
 0x263   : > { %v2330_v37 = vpop.eup %2329  ;;  %v1302_v59 = vrot.slane %v1301_v52, 1  ;;  %v1312_v38 = vrot.slane %v1311_v58, 4  ;;  %2341 = vtanh.f32 %v974_v31  ;;  %v1430_v25 = vrot.slane %v2797_v30, 7 }
 0x264   : > { %v2332_v62 = vpop.eup %2331  ;;  %v1310_v1 = vadd.f32 %v1309_v41, %v1308_v26  ;;  %v1320_v3 = vadd.f32 %v1319_v46, %v1318_v42  ;;  %2343 = vtanh.f32 %v966_v47  ;;  %v1275_v24 = vmul.f32 %v2330_v37, %v2748_v15 }
 0x265   : > { %v2334_v7 = vpop.eup %2333  ;;  %v1303_v8 = vadd.f32 %v1302_v59, %v1301_v52  ;;  %v1313_v10 = vadd.f32 %v1312_v38, %v1311_v58  ;;  %v1273_v32 = vmul.f32 %v2332_v62, %v2737_v9 }
 0x266   : > { %v2336_v27 = vpop.eup %2335  ;;  %v1321_v28 = vrot.slane %v1320_v3, 2  ;;  %v1276_v31 = vmul.f32 %v2334_v7, %v2750_v17  ;;  %v2824_v26 = vmul.f32 %v1417_v43, %v1310_v1  ;;  %v2237_v42 = vpop.f32.mrb[16].mxu1 }
 0x267   : > { %v1314_v41 = vrot.slane %v1313_v10, 2  ;;  %v1274_v46 = vmul.f32 %v2336_v27, %v2742_v11  ;;  %v2828_v52 = vmul.f32 %v2787_v2, %v1303_v8  ;;  %v987_v15 = vadd.f32 %v2237_v42, %v2763_v22  ;;  %v978_v58 = vpop.f32.mrb[17].mxu1 }
 0x268   : > { %v1322_v47 = vadd.f32 %v1321_v28, %v1320_v3  ;;  %v1332_v37 = vadd.f32 %v1276_v31, %v1275_v24  ;;  %v1613_v9 = vpack.c.bf16 %v2824_v26, %v2824_v26  ;;  %v979_v17 = vadd.f32 %v2763_v22, %v978_v58  ;;  %v2238_v59 = vpop.f32.mrb[18].mxu1 }
 0x269   : > { %v1315_v43 = vadd.f32 %v1314_v41, %v1313_v10  ;;  %v1325_v38 = vadd.f32 %v1274_v46, %v1273_v32  ;;  %v1612_v62 = vpack.c.bf16 %v2828_v52, %v2828_v52  ;;  %2345 = vtanh.f32 %v987_v15  ;;  %v981_v11 = vpop.f32.mrb[19].mxu1 }
 0x26a   : > { %v1323_v1 = vrot.slane %v1322_v47, 1  ;;  %v1333_v7 = vrot.slane %v1332_v37, 4  ;;  %v2836_v8 = vunpack.c.l.b16 %v1613_v9  ;;  %2347 = vtanh.f32 %v979_v17 }
 0x26b   : > { %v2338_v3 = vpop.eup %2337  ;;  %v1316_v24 = vrot.slane %v1315_v43, 1  ;;  %v1326_v27 = vrot.slane %v1325_v38, 4  ;;  %v2838_v28 = vunpack.c.l.b16 %v1612_v62  ;;  %v990_v31 = vadd.f32 %v2238_v59, %v2763_v22 }
 0x26c   : > { %v2340_v42 = vpop.eup %2339  ;;  %v1324_v10 = vadd.f32 %v1323_v1, %v1322_v47  ;;  %v1334_v32 = vadd.f32 %v1333_v7, %v1332_v37  ;;  %v1279_v41 = vmul.f32 %v2338_v3, %v2773_v33  ;;  %v1688_v46 = vrot.slane %v2836_v8, 7 }
 0x26d   : > { %v2342_v15 = vpop.eup %2341  ;;  %v1317_v58 = vadd.f32 %v1316_v24, %v1315_v43  ;;  %v1327_v12 = vadd.f32 %v1326_v27, %v1325_v38  ;;  %v1277_v9 = vmul.f32 %v2340_v42, %v2756_v20  ;;  %2349 = vtanh.f32 %v990_v31 }
 0x26e   : > { %v2344_v17 = vpop.eup %2343  ;;  %v1335_v49 = vrot.slane %v1334_v32, 2  ;;  %v1280_v62 = vmul.f32 %v2342_v15, %v2775_v35  ;;  %v2847_v59 = vmul.f32 %v1419_v54, %v1324_v10  ;;  %v982_v47 = vadd.f32 %v2763_v22, %v981_v11  ;;  %v2241_v37 = vpop.f32.mrb[20].mxu1 }
 0x26f   : > { %v1328_v33 = vrot.slane %v1327_v12, 2  ;;  %v1278_v1 = vmul.f32 %v2344_v17, %v2758_v21  ;;  %v2853_v43 = vmul.f32 %v1418_v34, %v1317_v58  ;;  %v1003_v20 = vadd.f32 %v2241_v37, %v2763_v22  ;;  %v994_v38 = vpop.f32.mrb[21].mxu1 }
 0x270   : > { %v1336_v7 = vadd.f32 %v1335_v49, %v1334_v32  ;;  %v1346_v35 = vadd.f32 %v1280_v62, %v1279_v41  ;;  %v1615_v54 = vpack.c.bf16 %v2847_v59, %v2847_v59  ;;  %2351 = vtanh.f32 %v982_v47  ;;  %v2242_v8 = vpop.f32.mrb[22].mxu1 }
 0x271   : > { %v1329_v11 = vadd.f32 %v1328_v33, %v1327_v12  ;;  %v1339_v3 = vadd.f32 %v1278_v1, %v1277_v9  ;;  %v1614_v24 = vpack.c.bf16 %v2853_v43, %v2853_v43  ;;  %2353 = vtanh.f32 %v1003_v20  ;;  %v997_v21 = vpop.f32.mrb[23].mxu1 }
 0x272   : > { %v1337_v27 = vrot.slane %v1336_v7, 1  ;;  %v1347_v34 = vrot.slane %v1346_v35, 4  ;;  %v2860_v31 = vunpack.c.l.b16 %v1615_v54  ;;  %v995_v42 = vadd.f32 %v2763_v22, %v994_v38 }
 0x273   : > { %v2346_v49 = vpop.eup %2345  ;;  %v1330_v10 = vrot.slane %v1329_v11, 1  ;;  %v1340_v32 = vrot.slane %v1339_v3, 4  ;;  %v1674_v41 = vunpack.c.l.b16 %v1614_v24  ;;  %v1006_v15 = vadd.f32 %v2242_v8, %v2763_v22 }
 0x274   : > { %v2348_v58 = vpop.eup %2347  ;;  %v1338_v12 = vadd.f32 %v1337_v27, %v1336_v7  ;;  %v1348_v9 = vadd.f32 %v1347_v34, %v1346_v35  ;;  %v1283_v17 = vmul.f32 %v2346_v49, %v2664_v44  ;;  %2355 = vtanh.f32 %v995_v42 }
 0x275   : > { %v1331_v62 = vadd.f32 %v1330_v10, %v1329_v11  ;;  %v1341_v47 = vadd.f32 %v1340_v32, %v1339_v3  ;;  %v1690_v37 = vrot.slane %v1674_v41, 6  ;;  %v1281_v33 = vmul.f32 %v2348_v58, %v2708_v61 }
 0x276   : > { %v1349_v1 = vrot.slane %v1348_v9, 2  ;;  %v2868_v20 = vmul.f32 %v1421_v36, %v1338_v12  ;;  %2357 = vtanh.f32 %v1006_v15  ;;  %v998_v38 = vadd.f32 %v2763_v22, %v997_v21  ;;  %v2245_v54 = vpop.f32.mrb[24].mxu1 }
 0x277   : > { %v2350_v7 = vpop.eup %2349  ;;  %v1342_v35 = vrot.slane %v1341_v47, 2  ;;  %v2873_v44 = vmul.f32 %v1420_v39, %v1331_v62  ;;  %v1019_v8 = vadd.f32 %v2245_v54, %v2763_v22  ;;  %v1010_v11 = vpop.f32.mrb[25].mxu1  ;;  %v1689_v61 = vsel %vm1480_vm0, %v1688_v46, %v2838_v28 }
 0x278   : > { %v1350_v3 = vadd.f32 %v1349_v1, %v1348_v9  ;;  %v1284_v36 = vmul.f32 %v2350_v7, %v2666_v45  ;;  %2359 = vtanh.f32 %v998_v38  ;;  %v1011_v24 = vadd.f32 %v2763_v22, %v1010_v11  ;;  %v2246_v21 = vpop.f32.mrb[26].mxu1 }
 0x279   : > { %v1343_v27 = vadd.f32 %v1342_v35, %v1341_v47  ;;  %2361 = vtanh.f32 %v1019_v8  ;;  %v1022_v34 = vadd.f32 %v2246_v21, %v2763_v22  ;;  %v1013_v39 = vpop.f32.mrb[27].mxu1  ;;  %v1616_v42 = vpack.c.bf16 %v2873_v44, %v2873_v44 }
 0x27a   : > { %v2352_v49 = vpop.eup %2351  ;;  %v1351_v10 = vrot.slane %v1350_v3, 1  ;;  %v1360_v32 = vadd.f32 %v1284_v36, %v1283_v17  ;;  %2363 = vtanh.f32 %v1011_v24  ;;  %v1014_v28 = vadd.f32 %v2763_v22, %v1013_v39 }
 0x27b   : > { %v2354_v46 = vpop.eup %2353  ;;  %v1344_v45 = vrot.slane %v1343_v27, 1  ;;  %v1282_v41 = vmul.f32 %v2352_v49, %v2713_v63  ;;  %2365 = vtanh.f32 %v1022_v34  ;;  %v1617_v15 = vpack.c.bf16 %v2868_v20, %v2868_v20 }
 0x27c   : > { %v1352_v58 = vadd.f32 %v1351_v10, %v1350_v3  ;;  %v1361_v12 = vrot.slane %v1360_v32, 4  ;;  %v1287_v9 = vmul.f32 %v2354_v46, %v2724_v4  ;;  %2367 = vtanh.f32 %v1014_v28 }
 0x27d   : > { %v1345_v62 = vadd.f32 %v1344_v45, %v1343_v27  ;;  %v1353_v47 = vadd.f32 %v1282_v41, %v1281_v33  ;;  %v1676_v1 = vunpack.c.l.b16 %v1616_v42  ;;  %v2888_v17 = vunpack.c.l.b16 %v1617_v15 }
 0x27e   : > { %v2356_v38 = vpop.eup %2355  ;;  %v2892_v54 = vmul.f32 %v1423_v40, %v1352_v58  ;;  %v1362_v63 = vadd.f32 %v1361_v12, %v1360_v32  ;;  %v2249_v7 = vpop.f32.mrb[28].mxu1  ;;  %v1691_v35 = vsel %vm1483_vm1, %v1690_v37, %v1689_v61  ;;  %v1692_v8 = vrot.slane %v2860_v31, 5 }
 0x27f   : > { %v2898_v4 = vmul.f32 %v1422_v53, %v1345_v62  ;;  %v1354_v11 = vrot.slane %v1353_v47, 4  ;;  %v1285_v33 = vmul.f32 %v2356_v38, %v2678_v50  ;;  %v1035_v3 = vadd.f32 %v2249_v7, %v2763_v22  ;;  %v1026_v36 = vpop.f32.mrb[29].mxu1 }
 0x280   : > { %v2358_v24 = vpop.eup %2357  ;;  %v1363_v40 = vrot.slane %v1362_v63, 2  ;;  %v1027_v21 = vadd.f32 %v2763_v22, %v1026_v36  ;;  %v2250_v27 = vpop.f32.mrb[30].mxu1  ;;  %v1619_v37 = vpack.c.bf16 %v2892_v54, %v2892_v54  ;;  %v1693_v31 = vsel %vm1486_vm2, %v1692_v8, %v1691_v35 }
 0x281   : > { %v1355_v2 = vadd.f32 %v1354_v11, %v1353_v47  ;;  %v1288_v53 = vmul.f32 %v2358_v24, %v2729_v6  ;;  %2369 = vtanh.f32 %v1035_v3  ;;  %v1038_v50 = vadd.f32 %v2250_v27, %v2763_v22  ;;  %v1029_v61 = vpop.f32.mrb[31].mxu1 }
 0x282   : > { %v2360_v34 = vpop.eup %2359  ;;  %v1364_v39 = vadd.f32 %v1363_v40, %v1362_v63  ;;  %2371 = vtanh.f32 %v1027_v21  ;;  %v1030_v42 = vadd.f32 %v2763_v22, %v1029_v61  ;;  %v1618_v49 = vpack.c.bf16 %v2898_v4, %v2898_v4 }
 0x283   : > { %v2362_v10 = vpop.eup %2361  ;;  %v1356_v32 = vrot.slane %v1355_v2, 2  ;;  %v1374_v28 = vadd.f32 %v1288_v53, %v1287_v9  ;;  %v1286_v46 = vmul.f32 %v2360_v34, %v2680_v51  ;;  %2373 = vtanh.f32 %v1038_v50 }
 0x284   : > { %v2364_v6 = vpop.eup %2363  ;;  %v1365_v45 = vrot.slane %v1364_v39, 1  ;;  %v1291_v41 = vmul.f32 %v2362_v10, %v2752_v18  ;;  %2375 = vtanh.f32 %v1030_v42  ;;  %v1678_v15 = vunpack.c.l.b16 %v1618_v49 }
 0x285   : > { %v2366_v58 = vpop.eup %2365  ;;  %v1357_v12 = vadd.f32 %v1356_v32, %v1355_v2  ;;  %v1375_v62 = vrot.slane %v1374_v28, 4  ;;  %v1367_v22 = vadd.f32 %v1286_v46, %v1285_v33  ;;  %v1289_v47 = vmul.f32 %v2364_v6, %v2744_v13 }
 0x286   : > { %v2368_v38 = vpop.eup %2367  ;;  %v1366_v63 = vadd.f32 %v1365_v45, %v1364_v39  ;;  %v1292_v9 = vmul.f32 %v2366_v58, %v2754_v19  ;;  %v1679_v7 = vunpack.c.l.b16 %v1619_v37  ;;  %v1694_v51 = vrot.slane %v1676_v1, 4 }
 0x287   : > { %v1358_v35 = vrot.slane %v1357_v12, 1  ;;  %v1376_v8 = vadd.f32 %v1375_v62, %v1374_v28  ;;  %v1368_v11 = vrot.slane %v1367_v22, 4  ;;  %v1290_v3 = vmul.f32 %v2368_v38, %v2746_v14 }
 0x288   : > { %v1388_v18 = vadd.f32 %v1292_v9, %v1291_v41  ;;  %v2918_v36 = vmul.f32 %v1424_v0, %v1366_v63  ;;  %v1695_v33 = vsel %vm1489_vm3, %v1694_v51, %v1693_v31  ;;  %v1696_v13 = vrot.slane %v2888_v17, 3 }
 0x289   : > { %v1359_v24 = vadd.f32 %v1358_v35, %v1357_v12  ;;  %v1377_v40 = vrot.slane %v1376_v8, 2  ;;  %v1369_v21 = vadd.f32 %v1368_v11, %v1367_v22  ;;  %v1381_v19 = vadd.f32 %v1290_v3, %v1289_v47 }
 0x28a   : > { %v1389_v1 = vrot.slane %v1388_v18, 4  ;;  %v1621_v27 = vpack.c.bf16 %v2918_v36, %v2918_v36  ;;  %v1697_v14 = vsel %vm1492_vm4, %v1696_v13, %v1695_v33  ;;  %v1698_v37 = vrot.slane %v1678_v15, 2 }
 0x28b   : > { %v2370_v2 = vpop.eup %2369  ;;  %v1378_v53 = vadd.f32 %v1377_v40, %v1376_v8  ;;  %v1370_v0 = vrot.slane %v1369_v21, 2  ;;  %v1382_v50 = vrot.slane %v1381_v19, 4  ;;  %v2926_v31 = vmul.f32 %v2797_v30, %v1359_v24 }
 0x28c   : > { %v2372_v17 = vpop.eup %2371  ;;  %v1390_v61 = vadd.f32 %v1389_v1, %v1388_v18  ;;  %v1295_v34 = vmul.f32 %v2370_v2, %v2780_v48  ;;  %v1681_v39 = vunpack.c.l.b16 %v1621_v27  ;;  %v1699_v42 = vsel %vm1495_vm5, %v1698_v37, %v1697_v14 }
 0x28d   : > { %v2374_v49 = vpop.eup %2373  ;;  %v1379_v10 = vrot.slane %v1378_v53, 1  ;;  %v1371_v32 = vadd.f32 %v1370_v0, %v1369_v21  ;;  %v1383_v28 = vadd.f32 %v1382_v50, %v1381_v19  ;;  %v1293_v46 = vmul.f32 %v2372_v17, %v2765_v23 }
 0x28e   : > { %v2376_v6 = vpop.eup %2375  ;;  %v1391_v45 = vrot.slane %v1390_v61, 2  ;;  %v1296_v41 = vmul.f32 %v2374_v49, %v2783_v56  ;;  %v1620_v15 = vpack.c.bf16 %v2926_v31, %v2926_v31  ;;  %v1702_v58 = vrot.slane %v1681_v39, 7 }
 0x28f   : > { %v1380_v12 = vadd.f32 %v1379_v10, %v1378_v53  ;;  %v1372_v62 = vrot.slane %v1371_v32, 1  ;;  %v1384_v48 = vrot.slane %v1383_v28, 2  ;;  %v1294_v22 = vmul.f32 %v2376_v6, %v2769_v29 }
 0x290   : > { %v1392_v47 = vadd.f32 %v1391_v45, %v1390_v61  ;;  %v1402_v38 = vadd.f32 %v1296_v41, %v1295_v34  ;;  %v1680_v63 = vunpack.c.l.b16 %v1620_v15  ;;  %v1700_v9 = vrot.slane %v1679_v7, 1 }
 0x291   : > { %v1373_v51 = vadd.f32 %v1372_v62, %v1371_v32  ;;  %v1385_v35 = vadd.f32 %v1384_v48, %v1383_v28  ;;  %v1395_v23 = vadd.f32 %v1294_v22, %v1293_v46  ;;  %v2937_v8 = vmul.f32 %v1426_v55, %v1380_v12 }
 0x292   : > { %v1393_v56 = vrot.slane %v1392_v47, 1  ;;  %v1403_v11 = vrot.slane %v1402_v38, 4  ;;  %v2940_v3 = vsel %vm1498_vm6, %v1700_v9, %v1699_v42  ;;  %v1703_v18 = vsel %vm1480_vm0, %v1702_v58, %v1680_v63 }
 0x293   : > { %v1386_v33 = vrot.slane %v1385_v35, 1  ;;  %v1396_v29 = vrot.slane %v1395_v23, 4  ;;  %v2945_v13 = vmul.f32 %v1425_v5, %v1373_v51  ;;  %v1623_v7 = vpack.c.bf16 %v2937_v8, %v2937_v8 }
 0x294   : > { %v1394_v24 = vadd.f32 %v1393_v56, %v1392_v47  ;;  %v1404_v40 = vadd.f32 %v1403_v11, %v1402_v38  ;;  %v1543_v55 = vmul.f32 %v2926_v31, %v2926_v31  ;;  %v1544_v21 = vmul.f32 %v2918_v36, %v2918_v36 }
 0x295   : > { %v1387_v19 = vadd.f32 %v1386_v33, %v1385_v35  ;;  %v1397_v1 = vadd.f32 %v1396_v29, %v1395_v23  ;;  %v1622_v27 = vpack.c.bf16 %v2945_v13, %v2945_v13  ;;  %v1683_v14 = vunpack.c.l.b16 %v1623_v7 }
 0x296   : > { %v1405_v37 = vrot.slane %v1404_v40, 2  ;;  %v2957_v5 = vmul.f32 %v1428_v57, %v1394_v24  ;;  %v1545_v2 = vmul.f32 %v2945_v13, %v2945_v13  ;;  %v1546_v53 = vmul.f32 %v2937_v8, %v2937_v8 }
 0x297   : > { %v1398_v0 = vrot.slane %v1397_v1, 2  ;;  %v2965_v50 = vmul.f32 %v1427_v60, %v1387_v19  ;;  %v1682_v17 = vunpack.c.l.b16 %v1622_v27  ;;  %v1706_v61 = vrot.slane %v1683_v14, 5 }
 0x298   : > { %v1406_v34 = vadd.f32 %v1405_v37, %v1404_v40  ;;  %v1625_v39 = vpack.c.bf16 %v2957_v5, %v2957_v5  ;;  %v1548_v57 = vmul.f32 %v2957_v5, %v2957_v5  ;;  %v1559_v42 = vrot.slane %v1544_v21, 7 }
 0x299   : > { %v1399_v49 = vadd.f32 %v1398_v0, %v1397_v1  ;;  %v1704_v10 = vrot.slane %v1682_v17, 6  ;;  %v1624_v32 = vpack.c.bf16 %v2965_v50, %v2965_v50  ;;  %v1547_v28 = vmul.f32 %v2965_v50, %v2965_v50 }
 0x29a   : > { %v1407_v60 = vrot.slane %v1406_v34, 1  ;;  %v1685_v46 = vunpack.c.l.b16 %v1625_v39  ;;  %v1560_v6 = vsel %vm1480_vm0, %v1559_v42, %v1543_v55  ;;  %v1561_v45 = vrot.slane %v1545_v2, 6 }
 0x29b   : > { %v1400_v41 = vrot.slane %v1399_v49, 1  ;;  %v1684_v15 = vunpack.c.l.b16 %v1624_v32  ;;  %v1705_v58 = vsel %vm1483_vm1, %v1704_v10, %v1703_v18  ;;  %v1563_v12 = vrot.slane %v1546_v53, 5 }
 0x29c   : > { %v1408_v62 = vadd.f32 %v1407_v60, %v1406_v34  ;;  %v1707_v48 = vsel %vm1486_vm2, %v1706_v61, %v1705_v58  ;;  %v1710_v22 = vrot.slane %v1685_v46, 3  ;;  %v1562_v47 = vsel %vm1483_vm1, %v1561_v45, %v1560_v6 }
 0x29d   : > { %v1401_v38 = vadd.f32 %v1400_v41, %v1399_v49  ;;  %v1708_v63 = vrot.slane %v1684_v15, 4  ;;  %v1564_v9 = vsel %vm1486_vm2, %v1563_v12, %v1562_v47  ;;  %v1565_v51 = vrot.slane %v1547_v28, 4 }
 0x29e   : > { %v1462_v35 = vmul.f32 %v1430_v25, %v1408_v62  ;;  %v1567_v23 = vrot.slane %v1548_v57, 3  ;;  %v1503_v56 = vmul.f32 %v2828_v52, %v2828_v52  ;;  %v1504_v11 = vmul.f32 %v2824_v26, %v2824_v26 }
 0x29f   : > { %v3104_v18 = vrot.slane %v2797_v30, 6  ;;  %v1709_v29 = vsel %vm1489_vm3, %v1708_v63, %v1707_v48  ;;  %v1566_v7 = vsel %vm1489_vm3, %v1565_v51, %v1564_v9  ;;  %v1505_v24 = vmul.f32 %v2853_v43, %v2853_v43 }
 0x2a0   : > { %v1627_v40 = vpack.c.bf16 %v1462_v35, %v1462_v35  ;;  %v1711_v25 = vsel %vm1492_vm4, %v1710_v22, %v1709_v29  ;;  %v1550_v55 = vmul.f32 %v1462_v35, %v1462_v35  ;;  %v1568_v21 = vsel %vm1492_vm4, %v1567_v23, %v1566_v7  ;;  %v1644_v7 = vld [vmem:[%s3101_s7] sm:$0x3] }
 0x2a1   : > { %v1461_v33 = vmul.f32 %v3104_v18, %v1401_v38  ;;  %v1506_v27 = vmul.f32 %v2847_v59, %v2847_v59  ;;  %v1507_v30 = vmul.f32 %v2873_v44, %v2873_v44  ;;  %v1508_v2 = vmul.f32 %v2868_v20, %v2868_v20 }
 0x2a2   : > { %v1687_v14 = vunpack.c.l.b16 %v1627_v40  ;;  %v1571_v37 = vrot.slane %v1550_v55, 1  ;;  %v1509_v53 = vmul.f32 %v2898_v4, %v2898_v4  ;;  %v1510_v61 = vmul.f32 %v2892_v54, %v2892_v54 }
 0x2a3   : > { %v1626_v19 = vpack.c.bf16 %v1461_v33, %v1461_v33  ;;  %v1549_v1 = vmul.f32 %v1461_v33, %v1461_v33  ;;  %v1519_v34 = vrot.slane %v1504_v11, 7  ;;  %v1521_v57 = vrot.slane %v1505_v24, 6 }
 0x2a4   : > { %v1714_v39 = vrot.slane %v1687_v14, 1  ;;  %v1523_v42 = vrot.slane %v1506_v27, 5  ;;  %v1525_v49 = vrot.slane %v1507_v30, 4  ;;  %v1527_v60 = vrot.slane %v1508_v2, 3 }
 0x2a5   : > { %v1686_v0 = vunpack.c.l.b16 %v1626_v19  ;;  %v1569_v17 = vrot.slane %v1549_v1, 2  ;;  %v1520_v28 = vsel %vm1480_vm0, %v1519_v34, %v1503_v56  ;;  %v1529_v45 = vrot.slane %v1509_v53, 2 }
 0x2a6   : > { %v1522_v6 = vsel %vm1483_vm1, %v1521_v57, %v1520_v28  ;;  %v1531_v41 = vrot.slane %v1510_v61, 1  ;;  %v1463_v12 = vmul.f32 %v2926_v31, %v2828_v52  ;;  %v1464_v62 = vmul.f32 %v2918_v36, %v2824_v26 }
 0x2a7   : > { %v1712_v10 = vrot.slane %v1686_v0, 2  ;;  %v1570_v32 = vsel %vm1495_vm5, %v1569_v17, %v1568_v21  ;;  %v1524_v58 = vsel %vm1486_vm2, %v1523_v42, %v1522_v6  ;;  %v1465_v47 = vmul.f32 %v2945_v13, %v2853_v43  ;;  %v3047_v0 = vld [vmem:[%s2656_s29 + $0x8] sm:$0xff]  ;;  %v2400_v42 = vld [vmem:[%s2656_s29 + $0x18] sm:$0xff] }
 0x2a8   : > { %v3007_v46 = vsel %vm1498_vm6, %v1571_v37, %v1570_v32  ;;  %v1526_v22 = vsel %vm1489_vm3, %v1525_v49, %v1524_v58  ;;  %v1466_v38 = vmul.f32 %v2937_v8, %v2847_v59  ;;  %v1467_v52 = vmul.f32 %v2965_v50, %v2873_v44  ;;  %v354_v58 = vld [vmem:[%s2656_s29] sm:$0xff] }
 0x2a9   : > { %v1713_v15 = vsel %vm1495_vm5, %v1712_v10, %v1711_v25  ;;  %v1528_v9 = vsel %vm1492_vm4, %v1527_v60, %v1526_v22  ;;  %v1468_v26 = vmul.f32 %v2957_v5, %v2868_v20  ;;  %v1469_v31 = vmul.f32 %v1461_v33, %v2898_v4 }
 0x2aa   : > { %v1715_v48 = vsel %vm1498_vm6, %v1714_v39, %v1713_v15  ;;  %v1530_v36 = vsel %vm1495_vm5, %v1529_v45, %v1528_v9  ;;  %v1470_v51 = vmul.f32 %v1462_v35, %v2892_v54  ;;  %v1479_v43 = vrot.slane %v1464_v62, 7 }
 0x2ab   : > { %v1716_v63 = vpack.c.b16 %v1715_v48, %v2940_v3  ;;  %v1532_v59 = vsel %vm1498_vm6, %v1531_v41, %v1530_v36  ;;  %v1482_v8 = vrot.slane %v1465_v47, 6  ;;  %v1488_v3 = vrot.slane %v1467_v52, 4  ;;  %v356_v48 = vld [vmem:[%s2656_s29 + $0x10] sm:$0xff]  ;;  %s2412_s29 = smov 2  }
 0x2ac   : > { %v1481_v13 = vsel %vm1480_vm0, %v1479_v43, %v1463_v12  ;;  %v1485_v23 = vrot.slane %v1466_v38, 5  ;;  %v1494_v50 = vrot.slane %v1469_v31, 2  ;;  %v1491_v5 = vrot.slane %v1468_v26, 3 }
 0x2ad   : > { %1831 = vmatmul.mubr.bf16.vlgmr.msra.gmra.mrb[32].mxu0 %v1716_v63  ;;  %v1484_v44 = vsel %vm1483_vm1, %v1482_v8, %v1481_v13  ;;  %v1497_v54 = vrot.slane %v1470_v51, 1  ;;  %v3105_v18 = vlaneseq }
 0x2ae   : > { %v1487_v20 = vsel %vm1486_vm2, %v1485_v23, %v1484_v44 }
 0x2af   : > { %v1490_v56 = vsel %vm1489_vm3, %v1488_v3, %v1487_v20  ;;  %v1647_v33 = vshrl.u32 %v3105_v18, 7 }
 0x2b0   : > { %v1493_v4 = vsel %vm1492_vm4, %v1491_v5, %v1490_v56 }
 0x2b1   : > { %v1496_v35 = vsel %vm1495_vm5, %v1494_v50, %v1493_v4  ;;  %v1648_v29 = vsub.s32 0, %v1647_v33  ;;  %v1652_v24 = vsub.s32 1, %v1647_v33 }
 0x2b2   : > { %v1499_v11 = vsel %vm1498_vm6, %v1497_v54, %v1496_v35 }
 0x2b3   : > { %v1649_v40 = vrot.slane %v1644_v7, %v1648_v29  ;;  %v1653_v25 = vrot.slane %v1644_v7, %v1652_v24 }
 0x380   : > { %v1832_v55 = vpop.f32.mrb[32].mxu0 }
 0x381   : > { %v1833_v21 = vadd.f32 %v1832_v55, %v1649_v40  ;;  %v1834_v19 = vpop.f32.mrb[33].mxu0 }
 0x382   : > { %v1835_v1 = vadd.f32 %v1834_v19, %v1653_v25  ;;  %v1836_v27 = vpop.f32.mrb[34].mxu0 }
 0x383   : > { %v1854_v30 = vand.u32 2147483647, %v1833_v21  ;;  %v1837_v14 = vadd.f32 %v1836_v27, %v1649_v40  ;;  %v1838_v37 = vpop.f32.mrb[35].mxu0  ;;  %v1848_v12 = vmax.f32 %v1833_v21, 0.0  ;;  %v1850_v62 = vmul.f32 %v1833_v21, %v354_v58 }
 0x384   : > { %v1839_v2 = vadd.f32 %v1838_v37, %v1653_v25  ;;  %v1885_v53 = vsel %vm1870_vm7, %v1835_v1, -1e+30  ;;  %v1907_v17 = vmul.f32 %v3047_v0, %v1835_v1 }
 0x385   : > { %v1856_v61 = vsub.f32 0.0, %v1854_v30  ;;  %1887 = vmax.xlane.f32.xlu1 %v1885_v53  ;;  %v1855_v34 = vand.u32 2147483647, %v1837_v14  ;;  %v1849_v47 = vmax.f32 %v1837_v14, 0.0  ;;  %v1851_v38 = vmul.f32 %v1837_v14, %v356_v48 }
 0x386   : > { %v1886_v39 = vsel %vm1870_vm7, %v1839_v2, -1e+30  ;;  %v3054_v57 = vsel %vm1870_vm7, %v1907_v17, 0.0  ;;  %v1908_v49 = vmul.f32 %v2400_v42, %v1839_v2  ;;  %v1852_v63 = vsub.f32 %v1848_v12, %v1850_v62 }
 0x387   : > { %v1858_v10 = vmul.f32 1.442695, %v1856_v61  ;;  %1889 = vmax.xlane.f32.xlu0 %v1886_v39  ;;  %v1857_v32 = vsub.f32 0.0, %v1855_v34  ;;  %v1853_v26 = vsub.f32 %v1849_v47, %v1851_v38 }
 0x388   : > { %v3059_v28 = vsel %vm1870_vm7, %v1908_v49, 0.0 }
 0x389   : > { %2377 = vpow2.f32 %v1858_v10  ;;  %1574 = vadd.xlane.f32.xlu1 %v3007_v46  ;;  %v1860_v60 = vmul.f32 1.442695, %v1857_v32 }
 0x38b   : > { %1534 = vadd.xlane.f32.xlu0 %v1532_v59  ;;  %2379 = vpow2.f32 %v1860_v60 }
 0x38f   : > { %1501 = vadd.xlane.f32.xlu0 %v1499_v11 }
 0x393   : > { %v2378_v6 = vpop.eup %2377 }
 0x394   : > { %v1862_v45 = vadd.f32 1.0, %v2378_v6 }
 0x395   : > { %v2380_v41 = vpop.eup %2379 }
 0x396   : > { %2381 = vlog2.f32 %v1862_v45  ;;  %v1863_v15 = vadd.f32 1.0, %v2380_v41 }
 0x398   : > { %2383 = vlog2.f32 %v1863_v15 }
 0x3a0   : > { %v2382_v22 = vpop.eup %2381 }
 0x3a1   : > { %v1865_v9 = vmul.f32 0.6931472, %v2382_v22 }
 0x3a2   : > { %v2384_v46 = vpop.eup %2383 }
 0x3a3   : > { %v1868_v52 = vadd.f32 %v1865_v9, %v1852_v63  ;;  %v1867_v36 = vmul.f32 0.6931472, %v2384_v46 }
 0x3a5   : > { %v1871_v31 = vsel %vm1870_vm7, %v1868_v52, 0.0  ;;  %v1869_v51 = vadd.f32 %v1867_v36, %v1853_v26 }
 0x3a6   : > { %v1873_v59 = vmul.f32 0.2, %v1871_v31 }
 0x3a7   : > { %v1872_v43 = vsel %vm1870_vm7, %v1869_v51, 0.0 }
 0x3a8   : > { %v1874_v8 = vmul.f32 0.8, %v1872_v43 }
 0x3aa   : > { %v3068_v3 = vadd.f32 %v1874_v8, %v1873_v59 }
 0x412   : > { %v3070_v13 = vpop.xlane.xlu1 %1887 }
 0x413   : > { %v1891_v23 = vsub.f32 %v1885_v53, %v3070_v13  ;;  %v1591_v53 = vsub.f32 1.0, %v3047_v0 }
 0x414   : > { %v3073_v44 = vpop.xlane.xlu0 %1889 }
 0x415   : > { %v1893_v50 = vmul.f32 1.442695, %v1891_v23  ;;  %v1892_v20 = vsub.f32 %v1886_v39, %v3073_v44 }
 0x416   : > { %v1575_v5 = vpop.xlane.xlu1 %1574 }
 0x417   : > { %2385 = vpow2.f32 %v1893_v50  ;;  %v1895_v56 = vmul.f32 1.442695, %v1892_v20  ;;  %vm1578_vm8 = vcmp.eq.f32.partialorder %v1575_v5, inf  ;;  %v1581_v33 = vand.u32 2147483648, %v1575_v5 }
 0x418   : > { %2387 = vrsqrt.f32 %v1575_v5  ;;  %v1535_v4 = vpop.xlane.xlu0 %1534  ;;  %vm1580_vm9 = vcmp.eq.f32.partialorder %v1575_v5, 0.0 }
 0x419   : > { %2389 = vpow2.f32 %v1895_v56  ;;  %vm1538_vm10 = vcmp.eq.f32.partialorder %v1535_v4, inf  ;;  %v1541_v40 = vand.u32 2147483648, %v1535_v4  ;;  %vm1540_vm11 = vcmp.eq.f32.partialorder %v1535_v4, 0.0 }
 0x41a   : > { %2391 = vrsqrt.f32 %v1535_v4 }
 0x41c   : > { %v1502_v30 = vpop.xlane.xlu0 %1501 }
 0x421   : > { %v2386_v16 = vpop.eup %2385 }
 0x422   : > { %v2388_v54 = vpop.eup %2387  ;;  %1897 = vadd.xlane.f32.xlu1 %v2386_v16 }
 0x423   : > { %v2390_v35 = vpop.eup %2389  ;;  %v1577_v11 = vmul.f32 %v2388_v54, %v1575_v5 }
 0x424   : > { %v2392_v18 = vpop.eup %2391  ;;  %1899 = vadd.xlane.f32.xlu0 %v2390_v35 }
 0x425   : > { %v1579_v29 = vsel %vm1578_vm8, %v1575_v5, %v1577_v11  ;;  %v1537_v7 = vmul.f32 %v2392_v18, %v1535_v4 }
 0x426   : > { %v1582_v24 = vsel %vm1580_vm9, %v1581_v33, %v1579_v29  ;;  %1911 = vadd.xlane.f32.xlu1 %v3054_v57 }
 0x427   : > { %v1539_v25 = vsel %vm1538_vm10, %v1535_v4, %v1537_v7  ;;  %v1584_v19 = vmax.f32 %v1582_v24, 1e-08 }
 0x428   : > { %v1542_v55 = vsel %vm1540_vm11, %v1541_v40, %v1539_v25  ;;  %1913 = vadd.xlane.f32.xlu0 %v3059_v28 }
 0x429   : > { %v1583_v21 = vmax.f32 %v1542_v55, 1e-08 }
 0x42b   : > { %v1585_v1 = vmul.f32 %v1584_v19, %v1583_v21 }
 0x42d   : > { %2393 = vrcp.f32 %v1585_v1 }
 0x437   : > { %v2394_v27 = vpop.eup %2393 }
 0x438   : > { %v1587_v14 = vmul.f32 %v2394_v27, %v1502_v30 }
 0x43a   : > { %v2086_v37 = vadd.f32 -1.0, %v1587_v14  ;;  %v2087_v2 = vadd.f32 -0.3, %v1587_v14 }
 0x43c   : > { %v1589_v17 = vmul.f32 %v2086_v37, %v2086_v37  ;;  %v1593_v61 = vmax.f32 %v2087_v2, 0.0 }
 0x43e   : > { %v1594_v34 = vmul.f32 %v1593_v61, %v1593_v61  ;;  %v1590_v39 = vmul.f32 %v3047_v0, %v1589_v17 }
 0x440   : > { %v1595_v57 = vmul.f32 %v1594_v34, %v1591_v53 }
 0x442   : > { %v1596_v42 = vadd.f32 %v1595_v57, %v1590_v39 }
 0x444   : > { %1598 = vrot.lane.b32.xlu1 %v1596_v42, %s2412_s29 }
 0x4af   : > { %v1898_v49 = vpop.xlane.xlu1 %1897 }
 0x4b0   : > { %2395 = vlog2.f32 %v1898_v49 }
 0x4b1   : > { %v1900_v10 = vpop.xlane.xlu0 %1899 }
 0x4b2   : > { %2397 = vlog2.f32 %v1900_v10 }
 0x4b3   : > { %v1912_v32 = vpop.xlane.xlu1 %1911 }
 0x4b5   : > { %v1914_v62 = vpop.xlane.xlu0 %1913 }
 0x4b7   : > { %v1599_v28 = vpop.permute.xlu1 %1598 }
 0x4b8   : > { %v1602_v60 = vsel %vm1601_vm12, %v1599_v28, 0.0 }
 0x4b9   : > { %1603 = vadd.xlane.f32.xlu0 %v1602_v60 }
 0x4ba   : > { %v2396_v6 = vpop.eup %2395 }
 0x4bb   : > { %v1902_v45 = vmul.f32 0.6931472, %v2396_v6 }
 0x4bc   : > { %v2398_v41 = vpop.eup %2397 }
 0x4bd   : > { %v1904_v15 = vmul.f32 0.6931472, %v2398_v41  ;;  %v1905_v0 = vadd.f32 %v1902_v45, %v3070_v13  ;;  %1876 = vadd.xlane.f32.xlu0 %v3068_v3 }
 0x4bf   : > { %v1915_v58 = vsub.f32 %v1905_v0, %v1912_v32  ;;  %v1906_v12 = vadd.f32 %v1904_v15, %v3073_v44 }
 0x4c1   : > { %v1917_v48 = vmul.f32 0.2, %v1915_v58  ;;  %v1916_v22 = vsub.f32 %v1906_v12, %v1914_v62 }
 0x4c3   : > { %v1918_v47 = vmul.f32 0.8, %v1916_v22  ;;  %v1919_v38 = vsel %vm1601_vm12, %v1917_v48, 0.0 }
 0x4c5   : > { %v1920_v63 = vsel %vm1601_vm12, %v1918_v47, 0.0 }
 0x4c6   : > { %v1921_v9 = vadd.f32 %v1920_v63, %v1919_v38 }
 0x4c8   : > { %1922 = vadd.xlane.f32.xlu0 %v1921_v9 }
 0x546   : > { %v1604_v46 = vpop.xlane.xlu0 %1603 }
 0x547   : > { %v1605_v52 = vrot.slane %v1604_v46, 4 }
 0x549   : > { %v1606_v26 = vadd.f32 %v1605_v52, %v1604_v46 }
 0x54a   : > { %v1877_v36 = vpop.xlane.xlu0 %1876 }
 0x54b   : > { %v1607_v31 = vrot.slane %v1606_v26, 2  ;;  %v1878_v51 = vrot.slane %v1877_v36, 4 }
 0x54d   : > { %v1879_v43 = vadd.f32 %v1878_v51, %v1877_v36  ;;  %v1608_v59 = vadd.f32 %v1607_v31, %v1606_v26 }
 0x54f   : > { %v1880_v8 = vrot.slane %v1879_v43, 2  ;;  %v1609_v3 = vrot.slane %v1608_v59, 1 }
 0x551   : > { %v1610_v13 = vadd.f32 %v1609_v3, %v1608_v59  ;;  %v1881_v23 = vadd.f32 %v1880_v8, %v1879_v43 }
 0x553   : > { %2251 = vpush %v1610_v13  ;;  %v1882_v44 = vrot.slane %v1881_v23, 1 }
 0x555   : > { %v1923_v50 = vpop.xlane.xlu0 %1922  ;;  %v1883_v20 = vadd.f32 %v1882_v44, %v1881_v23 }
 0x556   : > { %v1924_v5 = vrot.slane %v1923_v50, 4 }
 0x557   : > { %2253 = vpush %v1883_v20 }
 0x558   : > { %v1925_v56 = vadd.f32 %v1924_v5, %v1923_v50 }
 0x55a   : > { %v1926_v4 = vrot.slane %v1925_v56, 2 }
 0x55c   : > { %v1927_v16 = vadd.f32 %v1926_v4, %v1925_v56 }
 0x55e   : > { %v1928_v54 = vrot.slane %v1927_v16, 1 }
 0x560   : > { %v1929_v35 = vadd.f32 %v1928_v54, %v1927_v16 }
 0x562   : > { %2255 = vpush %v1929_v35 }
 0x584   : > { %s2252_s10 = spop %2251 }
 0x585   : > { %s1931_s13 = smul.f32 0.4, %s2252_s10 }
 0x587   : > { %s1934_s15 = smul.f32 0.0625, %s1931_s13 }
 0x588   : > { %s2254_s11 = spop %2253 }
 0x589   : > { %s1935_s12 = smul.f32 0.4, %s2254_s11 }
 0x58b   : > { %s1938_s14 = smul.f32 0.0078125, %s1935_s12 }
 0x58d   : > { %s1939_s19 = sadd.f32 %s1938_s14, %s1934_s15 }
 0x593   : > { %s2256_s16 = spop %2255 }
 0x594   : > { %s1940_s17 = smul.f32 0.2, %s2256_s16 }
 0x596   : > { %s1943_s20 = smul.f32 0.0625, %s1940_s17 }
 0x598   : > { %s1944_s24 = sadd.f32 %s1943_s20, %s1939_s19 }
 0x59a   : > { %v1945_v11 = vstv %s1944_s24 }
 0x59b   : > { %1946 = vst [vmem:[%s352_s23] sm:$0xff] %v1945_v11 }
 0x59c PF: > { %s18_s27 = sadd.s32 1, %s2407_s27  }
 0x59d   : > { %p15_p6 = scmp.ge.s32.totalorder %s18_s27, 4  }
 0x59f   :  { %17 = sbr.rel (!%p15_p6) target bundleno = 1 (0x1), region = 88 }

</bundles_post_ra>
